<compile_context>
chip_gen: v7x
topology: tpu7x:2x2x1
jax: 0.10.0
libtpu: 0.0.40
codegen_flags: <defaults>
</compile_context>

<pallas_src>
import numpy as np
import jax
import jax.numpy as jnp
from jax.experimental import pallas as pl
from jax.experimental.pallas import tpu as pltpu

# ----------------------------- configuration --------------------------------
VOCAB     = 100
SEQ       = 8            # max_length analog
DIM       = 32           # transformer width
HEADS     = 4
HEAD_DIM  = DIM // HEADS
MLP       = 4 * DIM
LAYERS    = 2            # resblocks (ViT-H-14 has 24; small synthetic stand-in)
BATCH     = 2
BS        = BATCH * SEQ
EPS       = 1e-5
NEG_INF   = -1e9
INV_SQRT2 = 0.7071067811865476
SCALE     = 1.0 / float(np.sqrt(HEAD_DIM))


# ------------------------------- kernel --------------------------------------
def _layernorm(x, g, b):
    mu = jnp.mean(x, axis=-1, keepdims=True)
    var = jnp.mean((x - mu) ** 2, axis=-1, keepdims=True)
    return (x - mu) * jax.lax.rsqrt(var + EPS) * g + b


def clip_text_kernel(tok_ref, tab_ref, pos_ref,
                     ln1g_ref, ln1b_ref,
                     wq_ref, bq_ref, wk_ref, bk_ref, wv_ref, bv_ref,
                     wo_ref, bo_ref,
                     ln2g_ref, ln2b_ref,
                     w1_ref, b1_ref, w2_ref, b2_ref,
                     lnfg_ref, lnfb_ref,
                     out_ref,
                     x_scr, o_scr, mask_scr):
    layer = pl.program_id(0)

    # ---- layer 0 only: embedding + positional, and the (S, S) additive mask ----
    @pl.when(layer == 0)
    def _():
        tok = tok_ref[...]                                        # (BS, 1) int32
        vocab_iota = jax.lax.broadcasted_iota(jnp.int32, (BS, VOCAB), 1)
        onehot = (vocab_iota == tok).astype(jnp.float32)          # (BS, VOCAB)
        emb = jnp.dot(onehot, tab_ref[...], preferred_element_type=jnp.float32)
        # broadcast add of positional embedding on a (B, S, D) view (no tile copy)
        x_scr[...] = (emb.reshape(BATCH, SEQ, DIM)
                      + pos_ref[...][None, :, :]).reshape(BS, DIM)
        # additive causal mask, built once and reused by every layer
        rows = jax.lax.broadcasted_iota(jnp.int32, (SEQ, SEQ), 0)
        cols = jax.lax.broadcasted_iota(jnp.int32, (SEQ, SEQ), 1)
        mask_scr[...] = jnp.where(cols > rows,
                                  jnp.float32(NEG_INF), jnp.float32(0.0))

    x = x_scr[...]                                                # (BS, D)
    mask = mask_scr[...]                                          # (S, S) additive

    # ---- attention branch: x + Wo(MHA(LN1(x))) ----
    h = _layernorm(x, ln1g_ref[...], ln1b_ref[...])
    q = jnp.dot(h, wq_ref[...], preferred_element_type=jnp.float32) + bq_ref[...]
    k = jnp.dot(h, wk_ref[...], preferred_element_type=jnp.float32) + bk_ref[...]
    v = jnp.dot(h, wv_ref[...], preferred_element_type=jnp.float32) + bv_ref[...]
    q3 = q.reshape(BATCH, SEQ, DIM)
    k3 = k.reshape(BATCH, SEQ, DIM)
    v3 = v.reshape(BATCH, SEQ, DIM)

    # Per-head attention; each head's output lands in its lane sub-slice of a
    # (BS, D) scratch so the output projection is one full-K matmul below.
    for hh in range(HEADS):                                       # static unroll
        sl = slice(hh * HEAD_DIM, (hh + 1) * HEAD_DIM)
        qh, kh, vh = q3[:, :, sl], k3[:, :, sl], v3[:, :, sl]
        s = jnp.einsum('bqd,bkd->bqk', qh, kh,
                       preferred_element_type=jnp.float32) * SCALE
        s = s + mask[None, :, :]
        s = s - jnp.max(s, axis=-1, keepdims=True)                # stable softmax
        p = jnp.exp(s)
        p = p * pl.reciprocal(jnp.sum(p, axis=-1, keepdims=True), approx=True)
        oh = jnp.einsum('bqk,bkd->bqd', p, vh,
                        preferred_element_type=jnp.float32)       # (B, S, Hd)
        o_scr[:, hh * HEAD_DIM:(hh + 1) * HEAD_DIM] = oh.reshape(BS, HEAD_DIM)

    # single full-K output projection with a plain (D, D) wo
    attn = jnp.dot(o_scr[...], wo_ref[...],
                   preferred_element_type=jnp.float32) + bo_ref[...]
    x = x + attn

    # ---- MLP branch: x + W2(GELU(W1(LN2(x)))) ----
    h = _layernorm(x, ln2g_ref[...], ln2b_ref[...])
    m = jnp.dot(h, w1_ref[...], preferred_element_type=jnp.float32) + b1_ref[...]
    m = 0.5 * m * (1.0 + jax.lax.erf(m * INV_SQRT2))              # exact (erf) GELU
    m = jnp.dot(m, w2_ref[...], preferred_element_type=jnp.float32) + b2_ref[...]
    x = x + m

    x_scr[...] = x                                                # carry residual stream

    @pl.when(layer == LAYERS - 1)
    def _():
        out_ref[...] = _layernorm(x, lnfg_ref[...], lnfb_ref[...])


# ------------------------------ wrapper ---------------------------------------
def _full2d(shape):
    return pl.BlockSpec(shape, lambda l: (0, 0))


def _per_layer(shape_tail):
    # stacked (LAYERS, *shape_tail); squeeze the layer axis, select block `l`.
    return pl.BlockSpec((None,) + shape_tail,
                        lambda l, _tail=shape_tail: (l,) + (0,) * len(_tail))


def frozen_openclip_embedder_forward(tokens, params):
    """encode_with_transformer: embed -> +pos -> resblocks (layer='last') -> ln_final."""
    # TODO(synk): open_clip.tokenize (BPE tokenizer) has no Pallas equivalent;
    #             this takes pre-tokenized int32 ids.
    tok2d = tokens.reshape(BS, 1).astype(jnp.int32)

    grid_spec = pltpu.PrefetchScalarGridSpec(
        num_scalar_prefetch=0,
        grid=(LAYERS,),
        in_specs=[
            _full2d((BS, 1)),                       # tokens
            _full2d((VOCAB, DIM)),                  # token embedding table
            _full2d((SEQ, DIM)),                    # positional embedding
            _per_layer((1, DIM)),                   # ln1_g
            _per_layer((1, DIM)),                   # ln1_b
            _per_layer((DIM, DIM)),                 # wq
            _per_layer((1, DIM)),                   # bq
            _per_layer((DIM, DIM)),                 # wk
            _per_layer((1, DIM)),                   # bk
            _per_layer((DIM, DIM)),                 # wv
            _per_layer((1, DIM)),                   # bv
            _per_layer((DIM, DIM)),                 # wo (plain, full-K projection)
            _per_layer((1, DIM)),                   # bo
            _per_layer((1, DIM)),                   # ln2_g
            _per_layer((1, DIM)),                   # ln2_b
            _per_layer((DIM, MLP)),                 # w1
            _per_layer((1, MLP)),                   # b1
            _per_layer((MLP, DIM)),                 # w2
            _per_layer((1, DIM)),                   # b2
            _full2d((1, DIM)),                      # lnf_g
            _full2d((1, DIM)),                      # lnf_b
        ],
        out_specs=pl.BlockSpec((BS, DIM), lambda l: (0, 0)),
        scratch_shapes=[
            pltpu.VMEM((BS, DIM), jnp.float32),     # residual stream x
            pltpu.VMEM((BS, DIM), jnp.float32),     # per-layer head-output buffer
            pltpu.VMEM((SEQ, SEQ), jnp.float32),    # additive causal mask (built once)
        ],
    )

    out2d = pl.pallas_call(
        clip_text_kernel,
        out_shape=jax.ShapeDtypeStruct((BS, DIM), jnp.float32),
        grid_spec=grid_spec,
        compiler_params=pltpu.CompilerParams(
            dimension_semantics=("arbitrary",),     # layer axis carries the residual stream
            # TODO(synk): at real width raise this (v6e/v5e) or bf16+MLP-tile (v7x).
            vmem_limit_bytes=32 * 1024 * 1024,
        ),
    )(tok2d, params['table'], params['pos'],
      params['ln1_g'], params['ln1_b'],
      params['wq'], params['bq'], params['wk'], params['bk'],
      params['wv'], params['bv'],
      params['wo'], params['bo'],
      params['ln2_g'], params['ln2_b'],
      params['w1'], params['b1'], params['w2'], params['b2'],
      params['lnf_g'], params['lnf_b'])
    return out2d.reshape(BATCH, SEQ, DIM)


def build_causal_mask(seq):
    # open_clip build_attention_mask: 0 on/below diagonal, -inf above.
    row = jax.lax.broadcasted_iota(jnp.int32, (seq, seq), 0)
    col = jax.lax.broadcasted_iota(jnp.int32, (seq, seq), 1)
    return jnp.where(col > row, jnp.float32(NEG_INF), jnp.float32(0.0))


# ------------------------- deterministic parameters ---------------------------
def init_params(key):
    ks = jax.random.split(key, 20)
    def nrm(k, shape, scale):
        return scale * jax.random.normal(k, shape, jnp.float32)
    return dict(
        table=nrm(ks[0], (VOCAB, DIM), 0.02),
        pos=nrm(ks[1], (SEQ, DIM), 0.01),
        lnf_g=1.0 + nrm(ks[2], (1, DIM), 0.01),
        lnf_b=nrm(ks[3], (1, DIM), 0.01),
        ln1_g=1.0 + nrm(ks[4], (LAYERS, 1, DIM), 0.01),
        ln1_b=nrm(ks[5], (LAYERS, 1, DIM), 0.01),
        wq=nrm(ks[6], (LAYERS, DIM, DIM), 0.02),
        bq=nrm(ks[7], (LAYERS, 1, DIM), 0.01),
        wk=nrm(ks[8], (LAYERS, DIM, DIM), 0.02),
        bk=nrm(ks[9], (LAYERS, 1, DIM), 0.01),
        wv=nrm(ks[10], (LAYERS, DIM, DIM), 0.02),
        bv=nrm(ks[11], (LAYERS, 1, DIM), 0.01),
        wo=nrm(ks[12], (LAYERS, DIM, DIM), 0.02),
        bo=nrm(ks[13], (LAYERS, 1, DIM), 0.01),
        ln2_g=1.0 + nrm(ks[14], (LAYERS, 1, DIM), 0.01),
        ln2_b=nrm(ks[15], (LAYERS, 1, DIM), 0.01),
        w1=nrm(ks[16], (LAYERS, DIM, MLP), 0.02),
        b1=nrm(ks[17], (LAYERS, 1, MLP), 0.01),
        w2=nrm(ks[18], (LAYERS, MLP, DIM), 0.02),
        b2=nrm(ks[19], (LAYERS, 1, DIM), 0.01),
    )


# --------------------------- pure-JAX reference --------------------------------
def _ln_ref(x, g, b):
    mu = x.mean(-1, keepdims=True)
    var = ((x - mu) ** 2).mean(-1, keepdims=True)
    return (x - mu) / jnp.sqrt(var + EPS) * g + b


def reference_forward(tokens, params):
    HP = jax.lax.Precision.HIGHEST
    mask = build_causal_mask(SEQ)
    x = params['table'][tokens] + params['pos'][None]
    for l in range(LAYERS):
        h = _ln_ref(x, params['ln1_g'][l, 0], params['ln1_b'][l, 0])
        q = jnp.einsum('bsd,df->bsf', h, params['wq'][l], precision=HP) + params['bq'][l, 0]
        k = jnp.einsum('bsd,df->bsf', h, params['wk'][l], precision=HP) + params['bk'][l, 0]
        v = jnp.einsum('bsd,df->bsf', h, params['wv'][l], precision=HP) + params['bv'][l, 0]
        q = q.reshape(BATCH, SEQ, HEADS, HEAD_DIM)
        k = k.reshape(BATCH, SEQ, HEADS, HEAD_DIM)
        v = v.reshape(BATCH, SEQ, HEADS, HEAD_DIM)
        s = jnp.einsum('bqhd,bkhd->bhqk', q, k, precision=HP) / np.sqrt(HEAD_DIM)
        s = s + mask[None, None]
        a = jax.nn.softmax(s, axis=-1)
        o = jnp.einsum('bhqk,bkhd->bqhd', a, v, precision=HP).reshape(BATCH, SEQ, DIM)
        o = jnp.einsum('bsd,df->bsf', o, params['wo'][l], precision=HP) + params['bo'][l, 0]
        x = x + o
        h = _ln_ref(x, params['ln2_g'][l, 0], params['ln2_b'][l, 0])
        m = jnp.einsum('bsd,df->bsf', h, params['w1'][l], precision=HP) + params['b1'][l, 0]
        m = 0.5 * m * (1.0 + jax.lax.erf(m * INV_SQRT2))
        m = jnp.einsum('bsf,fd->bsd', m, params['w2'][l], precision=HP) + params['b2'][l, 0]
        x = x + m
    return _ln_ref(x, params['lnf_g'][0], params['lnf_b'][0])


# ---------------------------------- main ---------------------------------------
if __name__ == "__main__":
    key = jax.random.PRNGKey(0)
    k_par, k_tok = jax.random.split(key)
    params = init_params(k_par)
    tokens = jax.random.randint(k_tok, (BATCH, SEQ), 0, VOCAB, dtype=jnp.int32)

    out = frozen_openclip_embedder_forward(tokens, params)
    out = jax.block_until_ready(out)

    assert out.shape == (BATCH, SEQ, DIM)
    ref = reference_forward(tokens, params)
    np.testing.assert_allclose(np.asarray(out), np.asarray(ref), rtol=2e-3, atol=2e-3)
    print("KERNEL_OK")
</pallas_src>

<mosaic_0001>
module attributes {stable_mosaic.version = 11 : i64} {
  func.func @clip_text_kernel(%arg0: i32, %arg1: memref<16x1xi32, #tpu.memory_space<vmem>>, %arg2: memref<100x32xf32, #tpu.memory_space<vmem>>, %arg3: memref<8x32xf32, #tpu.memory_space<vmem>>, %arg4: memref<1x1x32xf32, #tpu.memory_space<vmem>>, %arg5: memref<1x1x32xf32, #tpu.memory_space<vmem>>, %arg6: memref<1x32x32xf32, #tpu.memory_space<vmem>>, %arg7: memref<1x1x32xf32, #tpu.memory_space<vmem>>, %arg8: memref<1x32x32xf32, #tpu.memory_space<vmem>>, %arg9: memref<1x1x32xf32, #tpu.memory_space<vmem>>, %arg10: memref<1x32x32xf32, #tpu.memory_space<vmem>>, %arg11: memref<1x1x32xf32, #tpu.memory_space<vmem>>, %arg12: memref<1x32x32xf32, #tpu.memory_space<vmem>>, %arg13: memref<1x1x32xf32, #tpu.memory_space<vmem>>, %arg14: memref<1x1x32xf32, #tpu.memory_space<vmem>>, %arg15: memref<1x1x32xf32, #tpu.memory_space<vmem>>, %arg16: memref<1x32x128xf32, #tpu.memory_space<vmem>>, %arg17: memref<1x1x128xf32, #tpu.memory_space<vmem>>, %arg18: memref<1x128x32xf32, #tpu.memory_space<vmem>>, %arg19: memref<1x1x32xf32, #tpu.memory_space<vmem>>, %arg20: memref<1x32xf32, #tpu.memory_space<vmem>>, %arg21: memref<1x32xf32, #tpu.memory_space<vmem>>, %arg22: memref<16x32xf32, #tpu.memory_space<vmem>>, %arg23: memref<16x32xf32, #tpu.memory_space<vmem>>, %arg24: memref<16x32xf32, #tpu.memory_space<vmem>>, %arg25: memref<8x8xf32, #tpu.memory_space<vmem>>) attributes {dimension_semantics = [#tpu.dimension_semantics<arbitrary>], iteration_bounds = array<i64: 2>, scalar_prefetch = 0 : i64, scratch_operands = 3 : i64, tpu.core_type = #tpu.core_type<tc>, window_params = [{pipeline_mode = #tpu.pipeline_mode<synchronous>, transform_indices = @transform_0, window_bounds = array<i64: 16, 1>}, {pipeline_mode = #tpu.pipeline_mode<synchronous>, transform_indices = @transform_1, window_bounds = array<i64: 100, 32>}, {pipeline_mode = #tpu.pipeline_mode<synchronous>, transform_indices = @transform_2, window_bounds = array<i64: 8, 32>}, {transform_indices = @transform_3, window_bounds = array<i64: 1, 1, 32>}, {transform_indices = @transform_4, window_bounds = array<i64: 1, 1, 32>}, {transform_indices = @transform_5, window_bounds = array<i64: 1, 32, 32>}, {transform_indices = @transform_6, window_bounds = array<i64: 1, 1, 32>}, {transform_indices = @transform_7, window_bounds = array<i64: 1, 32, 32>}, {transform_indices = @transform_8, window_bounds = array<i64: 1, 1, 32>}, {transform_indices = @transform_9, window_bounds = array<i64: 1, 32, 32>}, {transform_indices = @transform_10, window_bounds = array<i64: 1, 1, 32>}, {transform_indices = @transform_11, window_bounds = array<i64: 1, 32, 32>}, {transform_indices = @transform_12, window_bounds = array<i64: 1, 1, 32>}, {transform_indices = @transform_13, window_bounds = array<i64: 1, 1, 32>}, {transform_indices = @transform_14, window_bounds = array<i64: 1, 1, 32>}, {transform_indices = @transform_15, window_bounds = array<i64: 1, 32, 128>}, {transform_indices = @transform_16, window_bounds = array<i64: 1, 1, 128>}, {transform_indices = @transform_17, window_bounds = array<i64: 1, 128, 32>}, {transform_indices = @transform_18, window_bounds = array<i64: 1, 1, 32>}, {pipeline_mode = #tpu.pipeline_mode<synchronous>, transform_indices = @transform_19, window_bounds = array<i64: 1, 32>}, {pipeline_mode = #tpu.pipeline_mode<synchronous>, transform_indices = @transform_20, window_bounds = array<i64: 1, 32>}, {pipeline_mode = #tpu.pipeline_mode<synchronous>, transform_indices = @transform_21, window_bounds = array<i64: 16, 32>}]} {
    %c0_i32 = arith.constant 0 : i32
    %0 = arith.cmpi eq, %arg0, %c0_i32 : i32
    %1 = arith.extui %0 : i1 to i32
    %c0_i32_0 = arith.constant 0 : i32
    %2 = arith.cmpi ne, %1, %c0_i32_0 : i32
    scf.if %2 {
      %c0_100 = arith.constant 0 : index
      %c0_101 = arith.constant 0 : index
      %205 = vector.load %arg1[%c0_100, %c0_101] : memref<16x1xi32, #tpu.memory_space<vmem>>, vector<16x1xi32>
      %206 = tpu.iota {dimensions = array<i32: 1>} : vector<16x100xi32>
      %207 = vector.broadcast %205 : vector<16x1xi32> to vector<16x100xi32>
      %208 = arith.cmpi eq, %206, %207 : vector<16x100xi32>
      %209 = arith.extui %208 : vector<16x100xi1> to vector<16x100xi32>
      %210 = arith.sitofp %209 : vector<16x100xi32> to vector<16x100xf32>
      %c0_102 = arith.constant 0 : index
      %c0_103 = arith.constant 0 : index
      %211 = vector.load %arg2[%c0_102, %c0_103] : memref<100x32xf32, #tpu.memory_space<vmem>>, vector<100x32xf32>
      %cst_104 = arith.constant dense<0.000000e+00> : vector<16x32xf32>
      %212 = tpu.matmul %210, %211, %cst_104 {dimension_numbers = #tpu.dot_dimension_numbers<[1], [0], [0], [1], [0, 0, 1, 1], [], []>} : vector<16x100xf32>, vector<100x32xf32>, vector<16x32xf32> -> vector<16x32xf32>
      %213 = vector.shape_cast %212 : vector<16x32xf32> to vector<2x8x32xf32>
      %c0_105 = arith.constant 0 : index
      %c0_106 = arith.constant 0 : index
      %214 = vector.load %arg3[%c0_105, %c0_106] : memref<8x32xf32, #tpu.memory_space<vmem>>, vector<8x32xf32>
      %215 = vector.shape_cast %214 : vector<8x32xf32> to vector<1x8x32xf32>
      %216 = vector.broadcast %215 : vector<1x8x32xf32> to vector<2x8x32xf32>
      %217 = arith.addf %213, %216 : vector<2x8x32xf32>
      %218 = vector.shape_cast %217 : vector<2x8x32xf32> to vector<16x32xf32>
      %c0_107 = arith.constant 0 : index
      %c0_108 = arith.constant 0 : index
      %219 = vector.load %arg23[%c0_107, %c0_108] : memref<16x32xf32, #tpu.memory_space<vmem>>, vector<16x32xf32>
      tpu.vector_store %arg23[%c0_107, %c0_108], %218 {strides = array<i32>} : memref<16x32xf32, #tpu.memory_space<vmem>>, vector<16x32xf32>,
      %220 = tpu.iota {dimensions = array<i32: 0>} : vector<8x8xi32>
      %221 = tpu.iota {dimensions = array<i32: 1>} : vector<8x8xi32>
      %222 = arith.cmpi sgt, %221, %220 : vector<8x8xi32>
      %cst_109 = arith.constant -1.000000e+09 : f32
      %cst_110 = arith.constant 0.000000e+00 : f32
      %223 = vector.broadcast %cst_109 : f32 to vector<8x8xf32>
      %224 = vector.broadcast %cst_110 : f32 to vector<8x8xf32>
      %225 = arith.select %222, %223, %224 : vector<8x8xi1>, vector<8x8xf32>
      %c0_111 = arith.constant 0 : index
      %c0_112 = arith.constant 0 : index
      %226 = vector.load %arg25[%c0_111, %c0_112] : memref<8x8xf32, #tpu.memory_space<vmem>>, vector<8x8xf32>
      tpu.vector_store %arg25[%c0_111, %c0_112], %225 {strides = array<i32>} : memref<8x8xf32, #tpu.memory_space<vmem>>, vector<8x8xf32>,
    } else {
    }
    %c0 = arith.constant 0 : index
    %c0_1 = arith.constant 0 : index
    %3 = vector.load %arg23[%c0, %c0_1] : memref<16x32xf32, #tpu.memory_space<vmem>>, vector<16x32xf32>
    %c0_2 = arith.constant 0 : index
    %c0_3 = arith.constant 0 : index
    %4 = vector.load %arg25[%c0_2, %c0_3] : memref<8x8xf32, #tpu.memory_space<vmem>>, vector<8x8xf32>
    %c0_4 = arith.constant 0 : index
    %c0_5 = arith.constant 0 : index
    %c0_6 = arith.constant 0 : index
    %5 = vector.load %arg4[%c0_4, %c0_5, %c0_6] : memref<1x1x32xf32, #tpu.memory_space<vmem>>, vector<1x1x32xf32>
    %6 = vector.shape_cast %5 : vector<1x1x32xf32> to vector<1x32xf32>
    %c0_7 = arith.constant 0 : index
    %c0_8 = arith.constant 0 : index
    %c0_9 = arith.constant 0 : index
    %7 = vector.load %arg5[%c0_7, %c0_8, %c0_9] : memref<1x1x32xf32, #tpu.memory_space<vmem>>, vector<1x1x32xf32>
    %8 = vector.shape_cast %7 : vector<1x1x32xf32> to vector<1x32xf32>
    %cst = arith.constant dense<0.000000e+00> : vector<16xf32>
    %9 = vector.multi_reduction <add>, %3, %cst [1] : vector<16x32xf32> to vector<16xf32>
    %10 = vector.shape_cast %9 : vector<16xf32> to vector<16x1xf32>
    %cst_10 = arith.constant 3.200000e+01 : f32
    %11 = vector.broadcast %cst_10 : f32 to vector<16x1xf32>
    %12 = arith.divf %10, %11 : vector<16x1xf32>
    %13 = vector.broadcast %12 : vector<16x1xf32> to vector<16x32xf32>
    %14 = arith.subf %3, %13 : vector<16x32xf32>
    %15 = arith.mulf %14, %14 : vector<16x32xf32>
    %cst_11 = arith.constant dense<0.000000e+00> : vector<16xf32>
    %16 = vector.multi_reduction <add>, %15, %cst_11 [1] : vector<16x32xf32> to vector<16xf32>
    %17 = vector.shape_cast %16 : vector<16xf32> to vector<16x1xf32>
    %cst_12 = arith.constant 3.200000e+01 : f32
    %18 = vector.broadcast %cst_12 : f32 to vector<16x1xf32>
    %19 = arith.divf %17, %18 : vector<16x1xf32>
    %20 = vector.broadcast %12 : vector<16x1xf32> to vector<16x32xf32>
    %21 = arith.subf %3, %20 : vector<16x32xf32>
    %cst_13 = arith.constant 9.99999974E-6 : f32
    %22 = vector.broadcast %cst_13 : f32 to vector<16x1xf32>
    %23 = arith.addf %19, %22 : vector<16x1xf32>
    %24 = math.rsqrt %23 : vector<16x1xf32>
    %25 = vector.broadcast %24 : vector<16x1xf32> to vector<16x32xf32>
    %26 = arith.mulf %21, %25 : vector<16x32xf32>
    %27 = vector.broadcast %6 : vector<1x32xf32> to vector<16x32xf32>
    %28 = arith.mulf %26, %27 : vector<16x32xf32>
    %29 = vector.broadcast %8 : vector<1x32xf32> to vector<16x32xf32>
    %30 = arith.addf %28, %29 : vector<16x32xf32>
    %c0_14 = arith.constant 0 : index
    %c0_15 = arith.constant 0 : index
    %c0_16 = arith.constant 0 : index
    %31 = vector.load %arg6[%c0_14, %c0_15, %c0_16] : memref<1x32x32xf32, #tpu.memory_space<vmem>>, vector<1x32x32xf32>
    %32 = vector.shape_cast %31 : vector<1x32x32xf32> to vector<32x32xf32>
    %cst_17 = arith.constant dense<0.000000e+00> : vector<16x32xf32>
    %33 = tpu.matmul %30, %32, %cst_17 {dimension_numbers = #tpu.dot_dimension_numbers<[1], [0], [0], [1], [0, 0, 1, 1], [], []>} : vector<16x32xf32>, vector<32x32xf32>, vector<16x32xf32> -> vector<16x32xf32>
    %c0_18 = arith.constant 0 : index
    %c0_19 = arith.constant 0 : index
    %c0_20 = arith.constant 0 : index
    %34 = vector.load %arg7[%c0_18, %c0_19, %c0_20] : memref<1x1x32xf32, #tpu.memory_space<vmem>>, vector<1x1x32xf32>
    %35 = vector.shape_cast %34 : vector<1x1x32xf32> to vector<1x32xf32>
    %36 = vector.broadcast %35 : vector<1x32xf32> to vector<16x32xf32>
    %37 = arith.addf %33, %36 : vector<16x32xf32>
    %c0_21 = arith.constant 0 : index
    %c0_22 = arith.constant 0 : index
    %c0_23 = arith.constant 0 : index
    %38 = vector.load %arg8[%c0_21, %c0_22, %c0_23] : memref<1x32x32xf32, #tpu.memory_space<vmem>>, vector<1x32x32xf32>
    %39 = vector.shape_cast %38 : vector<1x32x32xf32> to vector<32x32xf32>
    %cst_24 = arith.constant dense<0.000000e+00> : vector<16x32xf32>
    %40 = tpu.matmul %30, %39, %cst_24 {dimension_numbers = #tpu.dot_dimension_numbers<[1], [0], [0], [1], [0, 0, 1, 1], [], []>} : vector<16x32xf32>, vector<32x32xf32>, vector<16x32xf32> -> vector<16x32xf32>
    %c0_25 = arith.constant 0 : index
    %c0_26 = arith.constant 0 : index
    %c0_27 = arith.constant 0 : index
    %41 = vector.load %arg9[%c0_25, %c0_26, %c0_27] : memref<1x1x32xf32, #tpu.memory_space<vmem>>, vector<1x1x32xf32>
    %42 = vector.shape_cast %41 : vector<1x1x32xf32> to vector<1x32xf32>
    %43 = vector.broadcast %42 : vector<1x32xf32> to vector<16x32xf32>
    %44 = arith.addf %40, %43 : vector<16x32xf32>
    %c0_28 = arith.constant 0 : index
    %c0_29 = arith.constant 0 : index
    %c0_30 = arith.constant 0 : index
    %45 = vector.load %arg10[%c0_28, %c0_29, %c0_30] : memref<1x32x32xf32, #tpu.memory_space<vmem>>, vector<1x32x32xf32>
    %46 = vector.shape_cast %45 : vector<1x32x32xf32> to vector<32x32xf32>
    %cst_31 = arith.constant dense<0.000000e+00> : vector<16x32xf32>
    %47 = tpu.matmul %30, %46, %cst_31 {dimension_numbers = #tpu.dot_dimension_numbers<[1], [0], [0], [1], [0, 0, 1, 1], [], []>} : vector<16x32xf32>, vector<32x32xf32>, vector<16x32xf32> -> vector<16x32xf32>
    %c0_32 = arith.constant 0 : index
    %c0_33 = arith.constant 0 : index
    %c0_34 = arith.constant 0 : index
    %48 = vector.load %arg11[%c0_32, %c0_33, %c0_34] : memref<1x1x32xf32, #tpu.memory_space<vmem>>, vector<1x1x32xf32>
    %49 = vector.shape_cast %48 : vector<1x1x32xf32> to vector<1x32xf32>
    %50 = vector.broadcast %49 : vector<1x32xf32> to vector<16x32xf32>
    %51 = arith.addf %47, %50 : vector<16x32xf32>
    %52 = vector.shape_cast %37 : vector<16x32xf32> to vector<2x8x32xf32>
    %53 = vector.shape_cast %44 : vector<16x32xf32> to vector<2x8x32xf32>
    %54 = vector.shape_cast %51 : vector<16x32xf32> to vector<2x8x32xf32>
    %55 = vector.extract_strided_slice %52 {offsets = [0, 0, 0], sizes = [2, 8, 8], strides = [1, 1, 1]} : vector<2x8x32xf32> to vector<2x8x8xf32>
    %56 = vector.extract_strided_slice %53 {offsets = [0, 0, 0], sizes = [2, 8, 8], strides = [1, 1, 1]} : vector<2x8x32xf32> to vector<2x8x8xf32>
    %57 = vector.extract_strided_slice %54 {offsets = [0, 0, 0], sizes = [2, 8, 8], strides = [1, 1, 1]} : vector<2x8x32xf32> to vector<2x8x8xf32>
    "tpu.trace_start"() <{level = 10 : i32, message = "bqd,bkd->bqk"}> : () -> ()
    %cst_35 = arith.constant dense<0.000000e+00> : vector<2x8x8xf32>
    %58 = tpu.matmul %55, %56, %cst_35 {dimension_numbers = #tpu.dot_dimension_numbers<[2], [2], [1], [1], [0, 0, 0, 1, 1, 1], [0], [0]>} : vector<2x8x8xf32>, vector<2x8x8xf32>, vector<2x8x8xf32> -> vector<2x8x8xf32>
    "tpu.trace_stop"() : () -> ()
    %cst_36 = arith.constant 0.353553385 : f32
    %59 = vector.broadcast %cst_36 : f32 to vector<2x8x8xf32>
    %60 = arith.mulf %58, %59 : vector<2x8x8xf32>
    %61 = vector.shape_cast %4 : vector<8x8xf32> to vector<1x8x8xf32>
    %62 = vector.broadcast %61 : vector<1x8x8xf32> to vector<2x8x8xf32>
    %63 = arith.addf %60, %62 : vector<2x8x8xf32>
    %cst_37 = arith.constant dense<0xFF800000> : vector<2x8xf32>
    %64 = vector.multi_reduction <maximumf>, %63, %cst_37 [2] : vector<2x8x8xf32> to vector<2x8xf32>
    %65 = vector.shape_cast %64 : vector<2x8xf32> to vector<2x8x1xf32>
    %66 = vector.broadcast %65 : vector<2x8x1xf32> to vector<2x8x8xf32>
    %67 = arith.subf %63, %66 : vector<2x8x8xf32>
    %68 = math.exp %67 : vector<2x8x8xf32>
    %cst_38 = arith.constant dense<0.000000e+00> : vector<2x8xf32>
    %69 = vector.multi_reduction <add>, %68, %cst_38 [2] : vector<2x8x8xf32> to vector<2x8xf32>
    %70 = vector.shape_cast %69 : vector<2x8xf32> to vector<2x8x1xf32>
    %71 = tpu.reciprocal %70 {approx = true} : vector<2x8x1xf32> -> vector<2x8x1xf32>
    %72 = vector.broadcast %71 : vector<2x8x1xf32> to vector<2x8x8xf32>
    %73 = arith.mulf %68, %72 : vector<2x8x8xf32>
    "tpu.trace_start"() <{level = 10 : i32, message = "bqk,bkd->bqd"}> : () -> ()
    %cst_39 = arith.constant dense<0.000000e+00> : vector<2x8x8xf32>
    %74 = tpu.matmul %73, %57, %cst_39 {dimension_numbers = #tpu.dot_dimension_numbers<[2], [1], [1], [2], [0, 0, 0, 1, 1, 2], [0], [0]>} : vector<2x8x8xf32>, vector<2x8x8xf32>, vector<2x8x8xf32> -> vector<2x8x8xf32>
    "tpu.trace_stop"() : () -> ()
    %75 = vector.shape_cast %74 : vector<2x8x8xf32> to vector<16x8xf32>
    %c0_40 = arith.constant 0 : index
    %c0_41 = arith.constant 0 : index
    %76 = vector.load %arg24[%c0_40, %c0_41] : memref<16x32xf32, #tpu.memory_space<vmem>>, vector<16x8xf32>
    tpu.vector_store %arg24[%c0_40, %c0_41], %75 {strides = array<i32>} : memref<16x32xf32, #tpu.memory_space<vmem>>, vector<16x8xf32>,
    %77 = vector.extract_strided_slice %52 {offsets = [0, 0, 8], sizes = [2, 8, 8], strides = [1, 1, 1]} : vector<2x8x32xf32> to vector<2x8x8xf32>
    %78 = vector.extract_strided_slice %53 {offsets = [0, 0, 8], sizes = [2, 8, 8], strides = [1, 1, 1]} : vector<2x8x32xf32> to vector<2x8x8xf32>
    %79 = vector.extract_strided_slice %54 {offsets = [0, 0, 8], sizes = [2, 8, 8], strides = [1, 1, 1]} : vector<2x8x32xf32> to vector<2x8x8xf32>
    "tpu.trace_start"() <{level = 10 : i32, message = "bqd,bkd->bqk"}> : () -> ()
    %cst_42 = arith.constant dense<0.000000e+00> : vector<2x8x8xf32>
    %80 = tpu.matmul %77, %78, %cst_42 {dimension_numbers = #tpu.dot_dimension_numbers<[2], [2], [1], [1], [0, 0, 0, 1, 1, 1], [0], [0]>} : vector<2x8x8xf32>, vector<2x8x8xf32>, vector<2x8x8xf32> -> vector<2x8x8xf32>
    "tpu.trace_stop"() : () -> ()
    %cst_43 = arith.constant 0.353553385 : f32
    %81 = vector.broadcast %cst_43 : f32 to vector<2x8x8xf32>
    %82 = arith.mulf %80, %81 : vector<2x8x8xf32>
    %83 = vector.shape_cast %4 : vector<8x8xf32> to vector<1x8x8xf32>
    %84 = vector.broadcast %83 : vector<1x8x8xf32> to vector<2x8x8xf32>
    %85 = arith.addf %82, %84 : vector<2x8x8xf32>
    %cst_44 = arith.constant dense<0xFF800000> : vector<2x8xf32>
    %86 = vector.multi_reduction <maximumf>, %85, %cst_44 [2] : vector<2x8x8xf32> to vector<2x8xf32>
    %87 = vector.shape_cast %86 : vector<2x8xf32> to vector<2x8x1xf32>
    %88 = vector.broadcast %87 : vector<2x8x1xf32> to vector<2x8x8xf32>
    %89 = arith.subf %85, %88 : vector<2x8x8xf32>
    %90 = math.exp %89 : vector<2x8x8xf32>
    %cst_45 = arith.constant dense<0.000000e+00> : vector<2x8xf32>
    %91 = vector.multi_reduction <add>, %90, %cst_45 [2] : vector<2x8x8xf32> to vector<2x8xf32>
    %92 = vector.shape_cast %91 : vector<2x8xf32> to vector<2x8x1xf32>
    %93 = tpu.reciprocal %92 {approx = true} : vector<2x8x1xf32> -> vector<2x8x1xf32>
    %94 = vector.broadcast %93 : vector<2x8x1xf32> to vector<2x8x8xf32>
    %95 = arith.mulf %90, %94 : vector<2x8x8xf32>
    "tpu.trace_start"() <{level = 10 : i32, message = "bqk,bkd->bqd"}> : () -> ()
    %cst_46 = arith.constant dense<0.000000e+00> : vector<2x8x8xf32>
    %96 = tpu.matmul %95, %79, %cst_46 {dimension_numbers = #tpu.dot_dimension_numbers<[2], [1], [1], [2], [0, 0, 0, 1, 1, 2], [0], [0]>} : vector<2x8x8xf32>, vector<2x8x8xf32>, vector<2x8x8xf32> -> vector<2x8x8xf32>
    "tpu.trace_stop"() : () -> ()
    %97 = vector.shape_cast %96 : vector<2x8x8xf32> to vector<16x8xf32>
    %c0_47 = arith.constant 0 : index
    %c8 = arith.constant 8 : index
    %98 = vector.load %arg24[%c0_47, %c8] : memref<16x32xf32, #tpu.memory_space<vmem>>, vector<16x8xf32>
    tpu.vector_store %arg24[%c0_47, %c8], %97 {strides = array<i32>} : memref<16x32xf32, #tpu.memory_space<vmem>>, vector<16x8xf32>,
    %99 = vector.extract_strided_slice %52 {offsets = [0, 0, 16], sizes = [2, 8, 8], strides = [1, 1, 1]} : vector<2x8x32xf32> to vector<2x8x8xf32>
    %100 = vector.extract_strided_slice %53 {offsets = [0, 0, 16], sizes = [2, 8, 8], strides = [1, 1, 1]} : vector<2x8x32xf32> to vector<2x8x8xf32>
    %101 = vector.extract_strided_slice %54 {offsets = [0, 0, 16], sizes = [2, 8, 8], strides = [1, 1, 1]} : vector<2x8x32xf32> to vector<2x8x8xf32>
    "tpu.trace_start"() <{level = 10 : i32, message = "bqd,bkd->bqk"}> : () -> ()
    %cst_48 = arith.constant dense<0.000000e+00> : vector<2x8x8xf32>
    %102 = tpu.matmul %99, %100, %cst_48 {dimension_numbers = #tpu.dot_dimension_numbers<[2], [2], [1], [1], [0, 0, 0, 1, 1, 1], [0], [0]>} : vector<2x8x8xf32>, vector<2x8x8xf32>, vector<2x8x8xf32> -> vector<2x8x8xf32>
    "tpu.trace_stop"() : () -> ()
    %cst_49 = arith.constant 0.353553385 : f32
    %103 = vector.broadcast %cst_49 : f32 to vector<2x8x8xf32>
    %104 = arith.mulf %102, %103 : vector<2x8x8xf32>
    %105 = vector.shape_cast %4 : vector<8x8xf32> to vector<1x8x8xf32>
    %106 = vector.broadcast %105 : vector<1x8x8xf32> to vector<2x8x8xf32>
    %107 = arith.addf %104, %106 : vector<2x8x8xf32>
    %cst_50 = arith.constant dense<0xFF800000> : vector<2x8xf32>
    %108 = vector.multi_reduction <maximumf>, %107, %cst_50 [2] : vector<2x8x8xf32> to vector<2x8xf32>
    %109 = vector.shape_cast %108 : vector<2x8xf32> to vector<2x8x1xf32>
    %110 = vector.broadcast %109 : vector<2x8x1xf32> to vector<2x8x8xf32>
    %111 = arith.subf %107, %110 : vector<2x8x8xf32>
    %112 = math.exp %111 : vector<2x8x8xf32>
    %cst_51 = arith.constant dense<0.000000e+00> : vector<2x8xf32>
    %113 = vector.multi_reduction <add>, %112, %cst_51 [2] : vector<2x8x8xf32> to vector<2x8xf32>
    %114 = vector.shape_cast %113 : vector<2x8xf32> to vector<2x8x1xf32>
    %115 = tpu.reciprocal %114 {approx = true} : vector<2x8x1xf32> -> vector<2x8x1xf32>
    %116 = vector.broadcast %115 : vector<2x8x1xf32> to vector<2x8x8xf32>
    %117 = arith.mulf %112, %116 : vector<2x8x8xf32>
    "tpu.trace_start"() <{level = 10 : i32, message = "bqk,bkd->bqd"}> : () -> ()
    %cst_52 = arith.constant dense<0.000000e+00> : vector<2x8x8xf32>
    %118 = tpu.matmul %117, %101, %cst_52 {dimension_numbers = #tpu.dot_dimension_numbers<[2], [1], [1], [2], [0, 0, 0, 1, 1, 2], [0], [0]>} : vector<2x8x8xf32>, vector<2x8x8xf32>, vector<2x8x8xf32> -> vector<2x8x8xf32>
    "tpu.trace_stop"() : () -> ()
    %119 = vector.shape_cast %118 : vector<2x8x8xf32> to vector<16x8xf32>
    %c0_53 = arith.constant 0 : index
    %c16 = arith.constant 16 : index
    %120 = vector.load %arg24[%c0_53, %c16] : memref<16x32xf32, #tpu.memory_space<vmem>>, vector<16x8xf32>
    tpu.vector_store %arg24[%c0_53, %c16], %119 {strides = array<i32>} : memref<16x32xf32, #tpu.memory_space<vmem>>, vector<16x8xf32>,
    %121 = vector.extract_strided_slice %52 {offsets = [0, 0, 24], sizes = [2, 8, 8], strides = [1, 1, 1]} : vector<2x8x32xf32> to vector<2x8x8xf32>
    %122 = vector.extract_strided_slice %53 {offsets = [0, 0, 24], sizes = [2, 8, 8], strides = [1, 1, 1]} : vector<2x8x32xf32> to vector<2x8x8xf32>
    %123 = vector.extract_strided_slice %54 {offsets = [0, 0, 24], sizes = [2, 8, 8], strides = [1, 1, 1]} : vector<2x8x32xf32> to vector<2x8x8xf32>
    "tpu.trace_start"() <{level = 10 : i32, message = "bqd,bkd->bqk"}> : () -> ()
    %cst_54 = arith.constant dense<0.000000e+00> : vector<2x8x8xf32>
    %124 = tpu.matmul %121, %122, %cst_54 {dimension_numbers = #tpu.dot_dimension_numbers<[2], [2], [1], [1], [0, 0, 0, 1, 1, 1], [0], [0]>} : vector<2x8x8xf32>, vector<2x8x8xf32>, vector<2x8x8xf32> -> vector<2x8x8xf32>
    "tpu.trace_stop"() : () -> ()
    %cst_55 = arith.constant 0.353553385 : f32
    %125 = vector.broadcast %cst_55 : f32 to vector<2x8x8xf32>
    %126 = arith.mulf %124, %125 : vector<2x8x8xf32>
    %127 = vector.shape_cast %4 : vector<8x8xf32> to vector<1x8x8xf32>
    %128 = vector.broadcast %127 : vector<1x8x8xf32> to vector<2x8x8xf32>
    %129 = arith.addf %126, %128 : vector<2x8x8xf32>
    %cst_56 = arith.constant dense<0xFF800000> : vector<2x8xf32>
    %130 = vector.multi_reduction <maximumf>, %129, %cst_56 [2] : vector<2x8x8xf32> to vector<2x8xf32>
    %131 = vector.shape_cast %130 : vector<2x8xf32> to vector<2x8x1xf32>
    %132 = vector.broadcast %131 : vector<2x8x1xf32> to vector<2x8x8xf32>
    %133 = arith.subf %129, %132 : vector<2x8x8xf32>
    %134 = math.exp %133 : vector<2x8x8xf32>
    %cst_57 = arith.constant dense<0.000000e+00> : vector<2x8xf32>
    %135 = vector.multi_reduction <add>, %134, %cst_57 [2] : vector<2x8x8xf32> to vector<2x8xf32>
    %136 = vector.shape_cast %135 : vector<2x8xf32> to vector<2x8x1xf32>
    %137 = tpu.reciprocal %136 {approx = true} : vector<2x8x1xf32> -> vector<2x8x1xf32>
    %138 = vector.broadcast %137 : vector<2x8x1xf32> to vector<2x8x8xf32>
    %139 = arith.mulf %134, %138 : vector<2x8x8xf32>
    "tpu.trace_start"() <{level = 10 : i32, message = "bqk,bkd->bqd"}> : () -> ()
    %cst_58 = arith.constant dense<0.000000e+00> : vector<2x8x8xf32>
    %140 = tpu.matmul %139, %123, %cst_58 {dimension_numbers = #tpu.dot_dimension_numbers<[2], [1], [1], [2], [0, 0, 0, 1, 1, 2], [0], [0]>} : vector<2x8x8xf32>, vector<2x8x8xf32>, vector<2x8x8xf32> -> vector<2x8x8xf32>
    "tpu.trace_stop"() : () -> ()
    %141 = vector.shape_cast %140 : vector<2x8x8xf32> to vector<16x8xf32>
    %c0_59 = arith.constant 0 : index
    %c24 = arith.constant 24 : index
    %142 = vector.load %arg24[%c0_59, %c24] : memref<16x32xf32, #tpu.memory_space<vmem>>, vector<16x8xf32>
    tpu.vector_store %arg24[%c0_59, %c24], %141 {strides = array<i32>} : memref<16x32xf32, #tpu.memory_space<vmem>>, vector<16x8xf32>,
    %c0_60 = arith.constant 0 : index
    %c0_61 = arith.constant 0 : index
    %143 = vector.load %arg24[%c0_60, %c0_61] : memref<16x32xf32, #tpu.memory_space<vmem>>, vector<16x32xf32>
    %c0_62 = arith.constant 0 : index
    %c0_63 = arith.constant 0 : index
    %c0_64 = arith.constant 0 : index
    %144 = vector.load %arg12[%c0_62, %c0_63, %c0_64] : memref<1x32x32xf32, #tpu.memory_space<vmem>>, vector<1x32x32xf32>
    %145 = vector.shape_cast %144 : vector<1x32x32xf32> to vector<32x32xf32>
    %cst_65 = arith.constant dense<0.000000e+00> : vector<16x32xf32>
    %146 = tpu.matmul %143, %145, %cst_65 {dimension_numbers = #tpu.dot_dimension_numbers<[1], [0], [0], [1], [0, 0, 1, 1], [], []>} : vector<16x32xf32>, vector<32x32xf32>, vector<16x32xf32> -> vector<16x32xf32>
    %c0_66 = arith.constant 0 : index
    %c0_67 = arith.constant 0 : index
    %c0_68 = arith.constant 0 : index
    %147 = vector.load %arg13[%c0_66, %c0_67, %c0_68] : memref<1x1x32xf32, #tpu.memory_space<vmem>>, vector<1x1x32xf32>
    %148 = vector.shape_cast %147 : vector<1x1x32xf32> to vector<1x32xf32>
    %149 = vector.broadcast %148 : vector<1x32xf32> to vector<16x32xf32>
    %150 = arith.addf %146, %149 : vector<16x32xf32>
    %151 = arith.addf %3, %150 : vector<16x32xf32>
    %c0_69 = arith.constant 0 : index
    %c0_70 = arith.constant 0 : index
    %c0_71 = arith.constant 0 : index
    %152 = vector.load %arg14[%c0_69, %c0_70, %c0_71] : memref<1x1x32xf32, #tpu.memory_space<vmem>>, vector<1x1x32xf32>
    %153 = vector.shape_cast %152 : vector<1x1x32xf32> to vector<1x32xf32>
    %c0_72 = arith.constant 0 : index
    %c0_73 = arith.constant 0 : index
    %c0_74 = arith.constant 0 : index
    %154 = vector.load %arg15[%c0_72, %c0_73, %c0_74] : memref<1x1x32xf32, #tpu.memory_space<vmem>>, vector<1x1x32xf32>
    %155 = vector.shape_cast %154 : vector<1x1x32xf32> to vector<1x32xf32>
    %cst_75 = arith.constant dense<0.000000e+00> : vector<16xf32>
    %156 = vector.multi_reduction <add>, %151, %cst_75 [1] : vector<16x32xf32> to vector<16xf32>
    %157 = vector.shape_cast %156 : vector<16xf32> to vector<16x1xf32>
    %cst_76 = arith.constant 3.200000e+01 : f32
    %158 = vector.broadcast %cst_76 : f32 to vector<16x1xf32>
    %159 = arith.divf %157, %158 : vector<16x1xf32>
    %160 = vector.broadcast %159 : vector<16x1xf32> to vector<16x32xf32>
    %161 = arith.subf %151, %160 : vector<16x32xf32>
    %162 = arith.mulf %161, %161 : vector<16x32xf32>
    %cst_77 = arith.constant dense<0.000000e+00> : vector<16xf32>
    %163 = vector.multi_reduction <add>, %162, %cst_77 [1] : vector<16x32xf32> to vector<16xf32>
    %164 = vector.shape_cast %163 : vector<16xf32> to vector<16x1xf32>
    %cst_78 = arith.constant 3.200000e+01 : f32
    %165 = vector.broadcast %cst_78 : f32 to vector<16x1xf32>
    %166 = arith.divf %164, %165 : vector<16x1xf32>
    %167 = vector.broadcast %159 : vector<16x1xf32> to vector<16x32xf32>
    %168 = arith.subf %151, %167 : vector<16x32xf32>
    %cst_79 = arith.constant 9.99999974E-6 : f32
    %169 = vector.broadcast %cst_79 : f32 to vector<16x1xf32>
    %170 = arith.addf %166, %169 : vector<16x1xf32>
    %171 = math.rsqrt %170 : vector<16x1xf32>
    %172 = vector.broadcast %171 : vector<16x1xf32> to vector<16x32xf32>
    %173 = arith.mulf %168, %172 : vector<16x32xf32>
    %174 = vector.broadcast %153 : vector<1x32xf32> to vector<16x32xf32>
    %175 = arith.mulf %173, %174 : vector<16x32xf32>
    %176 = vector.broadcast %155 : vector<1x32xf32> to vector<16x32xf32>
    %177 = arith.addf %175, %176 : vector<16x32xf32>
    %c0_80 = arith.constant 0 : index
    %c0_81 = arith.constant 0 : index
    %c0_82 = arith.constant 0 : index
    %178 = vector.load %arg16[%c0_80, %c0_81, %c0_82] : memref<1x32x128xf32, #tpu.memory_space<vmem>>, vector<1x32x128xf32>
    %179 = vector.shape_cast %178 : vector<1x32x128xf32> to vector<32x128xf32>
    %cst_83 = arith.constant dense<0.000000e+00> : vector<16x128xf32>
    %180 = tpu.matmul %177, %179, %cst_83 {dimension_numbers = #tpu.dot_dimension_numbers<[1], [0], [0], [1], [0, 0, 1, 1], [], []>} : vector<16x32xf32>, vector<32x128xf32>, vector<16x128xf32> -> vector<16x128xf32>
    %c0_84 = arith.constant 0 : index
    %c0_85 = arith.constant 0 : index
    %c0_86 = arith.constant 0 : index
    %181 = vector.load %arg17[%c0_84, %c0_85, %c0_86] : memref<1x1x128xf32, #tpu.memory_space<vmem>>, vector<1x1x128xf32>
    %182 = vector.shape_cast %181 : vector<1x1x128xf32> to vector<1x128xf32>
    %183 = vector.broadcast %182 : vector<1x128xf32> to vector<16x128xf32>
    %184 = arith.addf %180, %183 : vector<16x128xf32>
    %cst_87 = arith.constant 5.000000e-01 : f32
    %185 = vector.broadcast %cst_87 : f32 to vector<16x128xf32>
    %186 = arith.mulf %185, %184 : vector<16x128xf32>
    %cst_88 = arith.constant 0.707106769 : f32
    %187 = vector.broadcast %cst_88 : f32 to vector<16x128xf32>
    %188 = arith.mulf %184, %187 : vector<16x128xf32>
    %189 = math.erf %188 : vector<16x128xf32>
    %cst_89 = arith.constant 1.000000e+00 : f32
    %190 = vector.broadcast %cst_89 : f32 to vector<16x128xf32>
    %191 = arith.addf %190, %189 : vector<16x128xf32>
    %192 = arith.mulf %186, %191 : vector<16x128xf32>
    %c0_90 = arith.constant 0 : index
    %c0_91 = arith.constant 0 : index
    %c0_92 = arith.constant 0 : index
    %193 = vector.load %arg18[%c0_90, %c0_91, %c0_92] : memref<1x128x32xf32, #tpu.memory_space<vmem>>, vector<1x128x32xf32>
    %194 = vector.shape_cast %193 : vector<1x128x32xf32> to vector<128x32xf32>
    %cst_93 = arith.constant dense<0.000000e+00> : vector<16x32xf32>
    %195 = tpu.matmul %192, %194, %cst_93 {dimension_numbers = #tpu.dot_dimension_numbers<[1], [0], [0], [1], [0, 0, 1, 1], [], []>} : vector<16x128xf32>, vector<128x32xf32>, vector<16x32xf32> -> vector<16x32xf32>
    %c0_94 = arith.constant 0 : index
    %c0_95 = arith.constant 0 : index
    %c0_96 = arith.constant 0 : index
    %196 = vector.load %arg19[%c0_94, %c0_95, %c0_96] : memref<1x1x32xf32, #tpu.memory_space<vmem>>, vector<1x1x32xf32>
    %197 = vector.shape_cast %196 : vector<1x1x32xf32> to vector<1x32xf32>
    %198 = vector.broadcast %197 : vector<1x32xf32> to vector<16x32xf32>
    %199 = arith.addf %195, %198 : vector<16x32xf32>
    %200 = arith.addf %151, %199 : vector<16x32xf32>
    %c0_97 = arith.constant 0 : index
    %c0_98 = arith.constant 0 : index
    %201 = vector.load %arg23[%c0_97, %c0_98] : memref<16x32xf32, #tpu.memory_space<vmem>>, vector<16x32xf32>
    tpu.vector_store %arg23[%c0_97, %c0_98], %200 {strides = array<i32>} : memref<16x32xf32, #tpu.memory_space<vmem>>, vector<16x32xf32>,
    %c1_i32 = arith.constant 1 : i32
    %202 = arith.cmpi eq, %arg0, %c1_i32 : i32
    %203 = arith.extui %202 : i1 to i32
    %c0_i32_99 = arith.constant 0 : i32
    %204 = arith.cmpi ne, %203, %c0_i32_99 : i32
    scf.if %204 {
      %c0_100 = arith.constant 0 : index
      %c0_101 = arith.constant 0 : index
      %205 = vector.load %arg20[%c0_100, %c0_101] : memref<1x32xf32, #tpu.memory_space<vmem>>, vector<1x32xf32>
      %c0_102 = arith.constant 0 : index
      %c0_103 = arith.constant 0 : index
      %206 = vector.load %arg21[%c0_102, %c0_103] : memref<1x32xf32, #tpu.memory_space<vmem>>, vector<1x32xf32>
      %cst_104 = arith.constant dense<0.000000e+00> : vector<16xf32>
      %207 = vector.multi_reduction <add>, %200, %cst_104 [1] : vector<16x32xf32> to vector<16xf32>
      %208 = vector.shape_cast %207 : vector<16xf32> to vector<16x1xf32>
      %cst_105 = arith.constant 3.200000e+01 : f32
      %209 = vector.broadcast %cst_105 : f32 to vector<16x1xf32>
      %210 = arith.divf %208, %209 : vector<16x1xf32>
      %211 = vector.broadcast %210 : vector<16x1xf32> to vector<16x32xf32>
      %212 = arith.subf %200, %211 : vector<16x32xf32>
      %213 = arith.mulf %212, %212 : vector<16x32xf32>
      %cst_106 = arith.constant dense<0.000000e+00> : vector<16xf32>
      %214 = vector.multi_reduction <add>, %213, %cst_106 [1] : vector<16x32xf32> to vector<16xf32>
      %215 = vector.shape_cast %214 : vector<16xf32> to vector<16x1xf32>
      %cst_107 = arith.constant 3.200000e+01 : f32
      %216 = vector.broadcast %cst_107 : f32 to vector<16x1xf32>
      %217 = arith.divf %215, %216 : vector<16x1xf32>
      %218 = vector.broadcast %210 : vector<16x1xf32> to vector<16x32xf32>
      %219 = arith.subf %200, %218 : vector<16x32xf32>
      %cst_108 = arith.constant 9.99999974E-6 : f32
      %220 = vector.broadcast %cst_108 : f32 to vector<16x1xf32>
      %221 = arith.addf %217, %220 : vector<16x1xf32>
      %222 = math.rsqrt %221 : vector<16x1xf32>
      %223 = vector.broadcast %222 : vector<16x1xf32> to vector<16x32xf32>
      %224 = arith.mulf %219, %223 : vector<16x32xf32>
      %225 = vector.broadcast %205 : vector<1x32xf32> to vector<16x32xf32>
      %226 = arith.mulf %224, %225 : vector<16x32xf32>
      %227 = vector.broadcast %206 : vector<1x32xf32> to vector<16x32xf32>
      %228 = arith.addf %226, %227 : vector<16x32xf32>
      %c0_109 = arith.constant 0 : index
      %c0_110 = arith.constant 0 : index
      %229 = vector.load %arg22[%c0_109, %c0_110] : memref<16x32xf32, #tpu.memory_space<vmem>>, vector<16x32xf32>
      tpu.vector_store %arg22[%c0_109, %c0_110], %228 {strides = array<i32>} : memref<16x32xf32, #tpu.memory_space<vmem>>, vector<16x32xf32>,
    } else {
    }
    return
  }
  func.func @transform_0(%arg0: i32) -> (i32, i32) {
    %c0_i32 = arith.constant 0 : i32
    %c0_i32_0 = arith.constant 0 : i32
    %c0_i32_1 = arith.constant 0 : i32
    return %c0_i32, %c0_i32_0 : i32, i32
  }
  func.func @transform_1(%arg0: i32) -> (i32, i32) {
    %c0_i32 = arith.constant 0 : i32
    %c0_i32_0 = arith.constant 0 : i32
    %c0_i32_1 = arith.constant 0 : i32
    return %c0_i32, %c0_i32_0 : i32, i32
  }
  func.func @transform_2(%arg0: i32) -> (i32, i32) {
    %c0_i32 = arith.constant 0 : i32
    %c0_i32_0 = arith.constant 0 : i32
    %c0_i32_1 = arith.constant 0 : i32
    return %c0_i32, %c0_i32_0 : i32, i32
  }
  func.func @transform_3(%arg0: i32) -> (i32, i32, i32) {
    %c0_i32 = arith.constant 0 : i32
    %c0_i32_0 = arith.constant 0 : i32
    %c0_i32_1 = arith.constant 0 : i32
    return %arg0, %c0_i32, %c0_i32_0 : i32, i32, i32
  }
  func.func @transform_4(%arg0: i32) -> (i32, i32, i32) {
    %c0_i32 = arith.constant 0 : i32
    %c0_i32_0 = arith.constant 0 : i32
    %c0_i32_1 = arith.constant 0 : i32
    return %arg0, %c0_i32, %c0_i32_0 : i32, i32, i32
  }
  func.func @transform_5(%arg0: i32) -> (i32, i32, i32) {
    %c0_i32 = arith.constant 0 : i32
    %c0_i32_0 = arith.constant 0 : i32
    %c0_i32_1 = arith.constant 0 : i32
    return %arg0, %c0_i32, %c0_i32_0 : i32, i32, i32
  }
  func.func @transform_6(%arg0: i32) -> (i32, i32, i32) {
    %c0_i32 = arith.constant 0 : i32
    %c0_i32_0 = arith.constant 0 : i32
    %c0_i32_1 = arith.constant 0 : i32
    return %arg0, %c0_i32, %c0_i32_0 : i32, i32, i32
  }
  func.func @transform_7(%arg0: i32) -> (i32, i32, i32) {
    %c0_i32 = arith.constant 0 : i32
    %c0_i32_0 = arith.constant 0 : i32
    %c0_i32_1 = arith.constant 0 : i32
    return %arg0, %c0_i32, %c0_i32_0 : i32, i32, i32
  }
  func.func @transform_8(%arg0: i32) -> (i32, i32, i32) {
    %c0_i32 = arith.constant 0 : i32
    %c0_i32_0 = arith.constant 0 : i32
    %c0_i32_1 = arith.constant 0 : i32
    return %arg0, %c0_i32, %c0_i32_0 : i32, i32, i32
  }
  func.func @transform_9(%arg0: i32) -> (i32, i32, i32) {
    %c0_i32 = arith.constant 0 : i32
    %c0_i32_0 = arith.constant 0 : i32
    %c0_i32_1 = arith.constant 0 : i32
    return %arg0, %c0_i32, %c0_i32_0 : i32, i32, i32
  }
  func.func @transform_10(%arg0: i32) -> (i32, i32, i32) {
    %c0_i32 = arith.constant 0 : i32
    %c0_i32_0 = arith.constant 0 : i32
    %c0_i32_1 = arith.constant 0 : i32
    return %arg0, %c0_i32, %c0_i32_0 : i32, i32, i32
  }
  func.func @transform_11(%arg0: i32) -> (i32, i32, i32) {
    %c0_i32 = arith.constant 0 : i32
    %c0_i32_0 = arith.constant 0 : i32
    %c0_i32_1 = arith.constant 0 : i32
    return %arg0, %c0_i32, %c0_i32_0 : i32, i32, i32
  }
  func.func @transform_12(%arg0: i32) -> (i32, i32, i32) {
    %c0_i32 = arith.constant 0 : i32
    %c0_i32_0 = arith.constant 0 : i32
    %c0_i32_1 = arith.constant 0 : i32
    return %arg0, %c0_i32, %c0_i32_0 : i32, i32, i32
  }
  func.func @transform_13(%arg0: i32) -> (i32, i32, i32) {
    %c0_i32 = arith.constant 0 : i32
    %c0_i32_0 = arith.constant 0 : i32
    %c0_i32_1 = arith.constant 0 : i32
    return %arg0, %c0_i32, %c0_i32_0 : i32, i32, i32
  }
  func.func @transform_14(%arg0: i32) -> (i32, i32, i32) {
    %c0_i32 = arith.constant 0 : i32
    %c0_i32_0 = arith.constant 0 : i32
    %c0_i32_1 = arith.constant 0 : i32
    return %arg0, %c0_i32, %c0_i32_0 : i32, i32, i32
  }
  func.func @transform_15(%arg0: i32) -> (i32, i32, i32) {
    %c0_i32 = arith.constant 0 : i32
    %c0_i32_0 = arith.constant 0 : i32
    %c0_i32_1 = arith.constant 0 : i32
    return %arg0, %c0_i32, %c0_i32_0 : i32, i32, i32
  }
  func.func @transform_16(%arg0: i32) -> (i32, i32, i32) {
    %c0_i32 = arith.constant 0 : i32
    %c0_i32_0 = arith.constant 0 : i32
    %c0_i32_1 = arith.constant 0 : i32
    return %arg0, %c0_i32, %c0_i32_0 : i32, i32, i32
  }
  func.func @transform_17(%arg0: i32) -> (i32, i32, i32) {
    %c0_i32 = arith.constant 0 : i32
    %c0_i32_0 = arith.constant 0 : i32
    %c0_i32_1 = arith.constant 0 : i32
    return %arg0, %c0_i32, %c0_i32_0 : i32, i32, i32
  }
  func.func @transform_18(%arg0: i32) -> (i32, i32, i32) {
    %c0_i32 = arith.constant 0 : i32
    %c0_i32_0 = arith.constant 0 : i32
    %c0_i32_1 = arith.constant 0 : i32
    return %arg0, %c0_i32, %c0_i32_0 : i32, i32, i32
  }
  func.func @transform_19(%arg0: i32) -> (i32, i32) {
    %c0_i32 = arith.constant 0 : i32
    %c0_i32_0 = arith.constant 0 : i32
    %c0_i32_1 = arith.constant 0 : i32
    return %c0_i32, %c0_i32_0 : i32, i32
  }
  func.func @transform_20(%arg0: i32) -> (i32, i32) {
    %c0_i32 = arith.constant 0 : i32
    %c0_i32_0 = arith.constant 0 : i32
    %c0_i32_1 = arith.constant 0 : i32
    return %c0_i32, %c0_i32_0 : i32, i32
  }
  func.func @transform_21(%arg0: i32) -> (i32, i32) {
    %c0_i32 = arith.constant 0 : i32
    %c0_i32_0 = arith.constant 0 : i32
    %c0_i32_1 = arith.constant 0 : i32
    return %c0_i32, %c0_i32_0 : i32, i32
  }
}

</mosaic_0001>

<bundles_post_ra>
// kernel: tpu_custom_call.1
= control target key start
LH: loop header
LB: loop body
LE: loop exit
PB: predicated region body
PF: predicated region fallthrough
CT: control target
= control target key end

     0   :  { %s4452_s0 = inlined_call_operand.vmem [shape: s32[16,1], index: 0, kind: input, shape index: {}]   ;;  %s4453_s1 = inlined_call_operand.vmem [shape: f32[100,32], index: 1, kind: input, shape index: {}]   ;;  %s4454_s2 = inlined_call_operand.vmem [shape: f32[8,32], index: 2, kind: input, shape index: {}]   ;;  %s4455_s3 = inlined_call_operand.vmem [shape: f32[2,1,32], index: 3, kind: input, shape index: {}]   ;;  %s4456_s4 = inlined_call_operand.vmem [shape: f32[2,1,32], index: 4, kind: input, shape index: {}]   ;;  %s4457_s5 = inlined_call_operand.vmem [shape: f32[2,32,32], index: 5, kind: input, shape index: {}]   ;;  %s4458_s6 = inlined_call_operand.vmem [shape: f32[2,1,32], index: 6, kind: input, shape index: {}]   ;;  %s4459_s7 = inlined_call_operand.vmem [shape: f32[2,32,32], index: 7, kind: input, shape index: {}]   ;;  %s4460_s8 = inlined_call_operand.vmem [shape: f32[2,1,32], index: 8, kind: input, shape index: {}]   ;;  %s4461_s9 = inlined_call_operand.vmem [shape: f32[2,32,32], index: 9, kind: input, shape index: {}]   ;;  %s4462_s10 = inlined_call_operand.vmem [shape: f32[2,1,32], index: 10, kind: input, shape index: {}]   ;;  %s4463_s11 = inlined_call_operand.vmem [shape: f32[2,32,32], index: 11, kind: input, shape index: {}]   ;;  %s4464_s12 = inlined_call_operand.vmem [shape: f32[2,1,32], index: 12, kind: input, shape index: {}]   ;;  %s4465_s13 = inlined_call_operand.vmem [shape: f32[2,1,32], index: 13, kind: input, shape index: {}]   ;;  %s4466_s14 = inlined_call_operand.vmem [shape: f32[2,1,32], index: 14, kind: input, shape index: {}]   ;;  %s4467_s15 = inlined_call_operand.vmem [shape: f32[2,32,128], index: 15, kind: input, shape index: {}]   ;;  %s4468_s16 = inlined_call_operand.vmem [shape: f32[2,1,128], index: 16, kind: input, shape index: {}]   ;;  %s4469_s17 = inlined_call_operand.vmem [shape: f32[2,128,32], index: 17, kind: input, shape index: {}]   ;;  %s4470_s18 = inlined_call_operand.vmem [shape: f32[2,1,32], index: 18, kind: input, shape index: {}]   ;;  %s4471_s19 = inlined_call_operand.vmem [shape: f32[1,32], index: 19, kind: input, shape index: {}]   ;;  %s4472_s20 = inlined_call_operand.vmem [shape: f32[1,32], index: 20, kind: input, shape index: {}]   ;;  %s4473_s21 = inlined_call_operand.hbm [shape: f32[16,32], index: 21, kind: output, shape index: {}]  }
   0x1   :  { %4480 = sst [smem:[#allocation10_spill]] %s4452_s0 }
   0x2   :  { %4481 = sst [smem:[#allocation11_spill]] %s4453_s1 }
   0x3   :  { %4482 = sst [smem:[#allocation12_spill]] %s4454_s2 }
   0x4   :  { %4483 = sst [smem:[#allocation13_spill]] %s4455_s3 }
   0x5   :  { %4484 = sst [smem:[#allocation14_spill]] %s4456_s4 }
   0x6   :  { %4485 = sst [smem:[#allocation15_spill]] %s4457_s5 }
   0x7   :  { %4486 = sst [smem:[#allocation16_spill]] %s4458_s6 }
   0x8   :  { %4487 = sst [smem:[#allocation17_spill]] %s4459_s7 }
   0x9   :  { %4488 = sst [smem:[#allocation18_spill]] %s4461_s9 }
   0xa   :  { %4489 = sst [smem:[#allocation19_spill]] %s4463_s11 }
   0xb   :  { %4490 = sst [smem:[#allocation20_spill]] %s4471_s19 }
   0xc   :  { %4491 = sst [smem:[#allocation21_spill]] %s4472_s20 }
   0xd   :  { %4492 = sst [smem:[#allocation22_spill]] %s4473_s21 }
   0xe   :  { %26 = vsyncpa [#allocation6], 0  ;;  %s3987_s2 = smov 0  }
   0xf LB: > { %4493 = sst [smem:[#allocation8_spill]] %s3863_s2  ;;  %s3993_s25 = sadd.s32 4294967295, %s3863_s2   ;;  %s3863_s2 = sphi %s3987_s2, %s32_s2  }
  0x10   : > { %4494 = sst [smem:[#allocation9_spill]] %s3993_s25  ;;  %p3286_p0 = scmp.ge.s32.totalorder %s3863_s2, 1 }
  0x11   : > { %p713_p1 = scmp.lt.s32.totalorder %s3863_s2, 3 }
  0x13   : > { %p714_p2 = pnand %p3286_p0, %p713_p1 }
  0x14   : > { %p823_p3 = scmp.lt.s32.totalorder (!%p714_p2), %s3993_s25, 1  ;;  %s4498_s2 = sld [smem:[#allocation15_spill]] (!%p714_p2) }
  0x15   : > { %717 = sbr.rel (%p714_p2) target bundleno = 4751 (0x128f), region = 104  ;;  %s4499_s7 = sld [smem:[#allocation17_spill]] (!%p714_p2) }
  0x16   : > { %s4500_s9 = sld [smem:[#allocation18_spill]] (!%p714_p2)  ;;  %s4501_s11 = sld [smem:[#allocation19_spill]] (!%p714_p2) }
  0x17   : > { %s4502_s30 = sld [smem:[#allocation9_spill]] (!%p714_p2) }
  0x1c   : > { %s3999_s26 = scalar_select %p823_p3, %s3993_s25, 1 }
  0x1d   : > { %p3299_p4 = scmp.ne.s32.totalorder %s4502_s30, 0 }
  0x1e   : > { %s3356_s22 = sshll.u32 %s3999_s26, 5  ;;  %s863_s0 = scalar_lea.vmem %s4465_s13, %s3999_s26  ;;  %v889_v2 = vlaneseq (!%p3299_p4)  ;;  %v3865_v3 = vmov (!%p3299_p4), 0   ;;  %vm1012_vm0 = vcmask (!%p3299_p4), 64512   ;;  %v3866_v17 = vmov (!%p3299_p4), 0.0  }
  0x1f   : > { %s4017_s21 = scalar_lea.vmem %s4498_s2, %s3356_s22  ;;  %s4022_s25 = scalar_lea.vmem %s4499_s7, %s3356_s22  ;;  %3778 = vset.pattern.permute.xlu0 (!%p3299_p4), %v3865_v3  ;;  %vm923_vm2 = vcmask (!%p3299_p4), 1043456   ;;  %vm916_vm3 = vcmask (!%p3299_p4), 818176   ;;  %vm1005_vm6 = vcmask (!%p3299_p4), 261120  }
  0x20   : > { %s4031_s5 = scalar_lea.vmem %s4500_s9, %s3356_s22  ;;  %s4040_s24 = scalar_lea.vmem %s4501_s11, %s3356_s22  ;;  %v890_v12 = vand.u32 (!%p3299_p4), 127, %v889_v2  ;;  %v1009_v13 = vshrl.u32 (!%p3299_p4), %v889_v2, 7 }
  0x21   : > { %s4057_s1 = scalar_lea.vmem %s4467_s15, %s3356_s22  ;;  %s874_s27 = scalar_lea.vmem %s4468_s16, %s3999_s26 }
  0x22   : > { %s3361_s11 = sshll.u32 %s3999_s26, 7  ;;  %s882_s4 = scalar_lea.vmem %s4470_s18, %s3999_s26  ;;  %vm1010_vm1 = vcmp.gt.s32.totalorder (!%p3299_p4), %v890_v12, %v1009_v13 }
  0x23   : > { %s4067_s7 = scalar_lea.vmem %s4469_s17, %s3361_s11  ;;  %886 = sbr.rel (%p3299_p4) target bundleno = 393 (0x189), region = 108  ;;  %v1011_v18 = vsel (!%p3299_p4), %vm1010_vm1, -1e+09, %v3866_v17 }
  0x24   : > { %s4503_s23 = sld [smem:[#allocation10_spill]] (!%p3299_p4)  ;;  %s4504_s3 = sld [smem:[#allocation11_spill]] (!%p3299_p4)  ;;  %1013 = vst.msk [vmem:[#allocation4] sm:$0xff] (!%p3299_p4), %vm1012_vm0, %v1011_v18 }
  0x25   : > { %s4505_s22 = sld [smem:[#allocation12_spill]] (!%p3299_p4) }
  0x2a   : > { %v887_v0 = vld [vmem:[%s4503_s23] sm:$0xff]  ;;  %v904_v4 = vld [vmem:[%s4504_s3 + $0x8] sm:$0xff]  ;;  %v905_v5 = vld [vmem:[%s4504_s3 + $0x10] sm:$0xff] }
  0x2b   : > { %v903_v1 = vld [vmem:[%s4504_s3] sm:$0xff]  ;;  %v906_v6 = vld [vmem:[%s4504_s3 + $0x18] sm:$0xff]  ;;  %892 = vperm.xlu0 %3778, %v887_v0   ;;  %v888_v9 = vld [vmem:[%s4503_s23 + $0x8] sm:$0xff] }
  0x2c   : > { %v3656_v7 = vpack.c.bf16 %v904_v4, %v903_v1  ;;  %v3660_v8 = vpack.c.bf16 %v906_v6, %v905_v5  ;;  %v907_v10 = vld [vmem:[%s4504_s3 + $0x20] sm:$0xff]  ;;  %v908_v11 = vld [vmem:[%s4504_s3 + $0x28] sm:$0xff]  ;;  %v909_v15 = vld [vmem:[%s4504_s3 + $0x30] sm:$0xff] }
  0x2d   : > { %v3664_v14 = vpack.c.bf16 %v908_v11, %v907_v10  ;;  %v910_v16 = vld [vmem:[%s4504_s3 + $0x38] sm:$0xff]  ;;  %v911_v20 = vld [vmem:[%s4504_s3 + $0x40] sm:$0xff]  ;;  %v912_v21 = vld [vmem:[%s4504_s3 + $0x48] sm:$0xff] }
  0x2e   : > { %3657 = vmatprep.subr.bf16.mxu0 %v3656_v7  ;;  %v3668_v19 = vpack.c.bf16 %v910_v16, %v909_v15  ;;  %v3672_v22 = vpack.c.bf16 %v912_v21, %v911_v20  ;;  %v913_v23 = vld [vmem:[%s4504_s3 + $0x50] sm:$0xff]  ;;  %v914_v24 = vld [vmem:[%s4504_s3 + $0x58] sm:$0xff]  ;;  %v915_v26 = vld [vmem:[%s4504_s3 + $0x60] sm:$0xf] }
  0x2f   : > { %3659 = vmatpush3.bf16.msra.mxu0 %v3656_v7  ;;  %895 = vperm.xlu0 %3778, %v888_v9   ;;  %v3676_v25 = vpack.c.bf16 %v914_v24, %v913_v23  ;;  %v1002_v31 = vld [vmem:[%s4505_s22] sm:$0xff] }
  0x30   : > { %3661 = vmatprep.subr.bf16.mxu0 %v3660_v8 }
  0x33   : > { %3663 = vmatpush3.bf16.msra.mxu0 %v3660_v8 }
  0x34   : > { %3665 = vmatprep.subr.bf16.mxu0 %v3664_v14 }
  0x37   : > { %3667 = vmatpush3.bf16.msra.mxu0 %v3664_v14 }
  0x38   : > { %3669 = vmatprep.subr.bf16.mxu0 %v3668_v19 }
  0x3b   : > { %3671 = vmatpush3.bf16.msra.mxu0 %v3668_v19 }
  0x3c   : > { %3673 = vmatprep.subr.bf16.mxu0 %v3672_v22 }
  0x3f   : > { %3675 = vmatpush3.bf16.msra.mxu0 %v3672_v22 }
  0x40   : > { %3677 = vmatprep.subr.bf16.mxu0 %v3676_v25 }
  0x43   : > { %3679 = vmatpush3.bf16.msra.mxu0 %v3676_v25 }
  0x44   : > { %3481 = vmatprep.subr.msk.mxu0 %vm923_vm2, %v915_v26 }
  0x47   : > { %3482 = vmatpush3.msk.msra.mxu0 %vm923_vm2, %v915_v26 }
  0xaa   : > { %v893_v27 = vpop.permute.xlu0 %892 }
  0xab   : > { %vm897_vm4 = vcmp.eq.s32.totalorder %v890_v12, %v893_v27 }
  0xac   : > { %v3300_v28 = vsel %vm897_vm4, 1.0, %v3866_v17 }
  0xad   : > { %3483 = vmatprep.mubr.msk.f32.mxu0 %vm916_vm3, %v3300_v28 }
  0xae   : > { %v896_v29 = vpop.permute.xlu0 %895 }
  0xaf   : > { %vm898_vm5 = vcmp.eq.s32.totalorder %v890_v12, %v896_v29 }
  0xb0   : > { %v3301_v30 = vsel %vm898_vm5, 1.0, %v3866_v17 }
  0xb1   : > { %3484 = vmatmul.mubr.msk.f32.vlgmr.msra.gmra.mrb[0].mxu0 %vm916_vm3, %v3301_v30 }
 0x184   : > { %v3485_v32 = vpop.f32.mrb[0].mxu0 }
 0x185   : > { %v1004_v33 = vadd.f32 %v3485_v32, %v1002_v31  ;;  %v993_v34 = vpop.f32.mrb[1].mxu0 }
 0x186   : > { %v1003_v35 = vadd.f32 %v1002_v31, %v993_v34 }
 0x187   : > { %1007 = vst.msk [vmem:[#allocation2 + $0x8] sm:$0xff] %vm1005_vm6, %v1004_v33 }
 0x188   : > { %1006 = vst.msk [vmem:[#allocation2] sm:$0xff] %vm1005_vm6, %v1003_v35 }
 0x189 PF: > { %vm1019_vm7 = vcmask 261120   ;;  %v1063_v50 = vld [vmem:[%s4017_s21] sm:$0xff]  ;;  %v1064_v51 = vld [vmem:[%s4017_s21 + $0x8] sm:$0xff]  ;;  %v1065_v52 = vld [vmem:[%s4017_s21 + $0x10] sm:$0xff]  ;;  %s4506_s11 = sld [smem:[#allocation13_spill]]  ;;  %s4508_s28 = sld [smem:[#allocation14_spill]] }
 0x18a   : > { %v3680_v53 = vpack.c.bf16 %v1064_v51, %v1063_v50  ;;  %v1066_v54 = vld [vmem:[%s4017_s21 + $0x18] sm:$0xff]  ;;  %v1155_v56 = vld [vmem:[%s4022_s25] sm:$0xff]  ;;  %v1156_v57 = vld [vmem:[%s4022_s25 + $0x8] sm:$0xff]  ;;  %v3867_v20 = vmov 0.0   ;;  %vm3868_vm8 = vmmov 0   ;;  %s4510_s9 = scalar_lea.vmem %s4460_s8, %s3999_s26  ;;  %vm1327_vm9 = vcmask 64512   ;;  %s4513_s20 = scalar_lea.vmem %s4462_s10, %s3999_s26 }
 0x18b   : > { %v3684_v55 = vpack.c.bf16 %v1066_v54, %v1065_v52  ;;  %v3688_v58 = vpack.c.bf16 %v1156_v57, %v1155_v56  ;;  %v1157_v9 = vld [vmem:[%s4022_s25 + $0x10] sm:$0xff]  ;;  %v1158_v10 = vld [vmem:[%s4022_s25 + $0x18] sm:$0xff]  ;;  %v1241_v14 = vld [vmem:[%s4031_s5] sm:$0xff]  ;;  %3529 = vmatprep.subr.mxu0 %v3867_v20  ;;  %3531 = vmatprep.mubr.msk.f32.mxu0 %vm3868_vm8, %v3867_v20  ;;  %s4511_s21 = sld [smem:[#allocation16_spill]]  ;;  %s3869_s29 = smov 120   ;;  %vm1998_vm10 = vcmask 130112  }
 0x18c   : > { %3681 = vmatprep.subr.bf16.mxu1 %v3680_v53  ;;  %v3692_v13 = vpack.c.bf16 %v1158_v10, %v1157_v9  ;;  %v1242_v15 = vld [vmem:[%s4031_s5 + $0x8] sm:$0xff]  ;;  %v1243_v17 = vld [vmem:[%s4031_s5 + $0x10] sm:$0xff]  ;;  %v1244_v18 = vld [vmem:[%s4031_s5 + $0x18] sm:$0xff]  ;;  %s3872_s25 = smov 8   ;;  %s3873_s5 = smov 16   ;;  %vm2343_vm11 = vcmask 195712  }
 0x18d   : > { %3683 = vmatpush3.bf16.msra.mxu1 %v3680_v53  ;;  %v3696_v16 = vpack.c.bf16 %v1242_v15, %v1241_v14  ;;  %v3700_v19 = vpack.c.bf16 %v1244_v18, %v1243_v17  ;;  %v3310_v23 = vld [vmem:[%s4510_s9] ss:$0 sm:$0xff]  ;;  %s3874_s9 = smov 24   ;;  %vm2688_vm12 = vcmask 261312   ;;  %s4514_s22 = scalar_lea.vmem %s4464_s12, %s3999_s26 }
 0x18e   : > { %v4124_v37 = vld [vmem:[#allocation2 + $0x8] sm:$0xff]  ;;  %3685 = vmatprep.subr.bf16.mxu1 %v3684_v55  ;;  %v3313_v30 = vld [vmem:[%s4513_s20] ss:$0 sm:$0xff] }
 0x18f   : > { %v4122_v36 = vld [vmem:[#allocation2] sm:$0xff]  ;;  %v1023_v39 = vsel %vm1019_vm7, %v4124_v37, 0.0  ;;  %s4507_s19 = scalar_lea.vmem %s4506_s11, %s3999_s26  ;;  %s4509_s30 = scalar_lea.vmem %s4508_s28, %s3999_s26 }
 0x190   : > { %v1020_v38 = vsel %vm1019_vm7, %v4122_v36, 0.0  ;;  %v3305_v2 = vld [vmem:[%s4507_s19] ss:$0 sm:$0xff]  ;;  %s3870_s28 = smov 112   ;;  %s4515_s19 = scalar_lea.vmem %s4466_s14, %s3999_s26 }
 0x191   : > { %1021 = vadd.xlane.f32.xlu0 %v1020_v38  ;;  %3687 = vmatpush3.bf16.msra.mxu1 %v3684_v55  ;;  %v3306_v4 = vld [vmem:[%s4509_s30] ss:$0 sm:$0xff]  ;;  %s4512_s2 = scalar_lea.vmem %s4511_s21, %s3999_s26  ;;  %s3871_s30 = smov 104  }
 0x192   : > { %3689 = vmatprep.subr.bf16.mxu1 %v3688_v58  ;;  %v3307_v26 = vld [vmem:[%s4512_s2] ss:$0 sm:$0xff] }
 0x195   : > { %1024 = vadd.xlane.f32.xlu0 %v1023_v39  ;;  %v4213_v39 = vld [vmem:[#allocation4] sm:$0xff] }
 0x21e   : > { %v1022_v40 = vpop.xlane.xlu0 %1021 }
 0x21f   : > { %v1027_v41 = vmul.f32 0.03125, %v1022_v40 }
 0x221   : > { %v1029_v42 = vsub.f32 %v4122_v36, %v1027_v41 }
 0x222   : > { %v1025_v43 = vpop.xlane.xlu0 %1024 }
 0x223   : > { %v1028_v44 = vmul.f32 0.03125, %v1025_v43  ;;  %v1031_v45 = vmul.f32 %v1029_v42, %v1029_v42 }
 0x225   : > { %v1030_v46 = vsub.f32 %v4124_v37, %v1028_v44  ;;  %v1033_v47 = vsel %vm1019_vm7, %v1031_v45, 0.0 }
 0x226   : > { %1034 = vadd.xlane.f32.xlu1 %v1033_v47 }
 0x227   : > { %v1032_v48 = vmul.f32 %v1030_v46, %v1030_v46 }
 0x229   : > { %v1036_v49 = vsel %vm1019_vm7, %v1032_v48, 0.0 }
 0x22a   : > { %1037 = vadd.xlane.f32.xlu1 %v1036_v49 }
 0x2b3   : > { %v1035_v59 = vpop.xlane.xlu1 %1034 }
 0x2b4   : > { %v1039_v60 = vmul.f32 0.03125, %v1035_v59 }
 0x2b6   : > { %v1041_v61 = vadd.f32 1e-05, %v1039_v60 }
 0x2b7   : > { %v1038_v62 = vpop.xlane.xlu1 %1037 }
 0x2b8   : > { %3779 = vrsqrt.f32 %v1041_v61  ;;  %v1040_v63 = vmul.f32 0.03125, %v1038_v62 }
 0x2ba   : > { %v1042_v0 = vadd.f32 1e-05, %v1040_v63 }
 0x2bc   : > { %3781 = vrsqrt.f32 %v1042_v0 }
 0x2c2   : > { %v3780_v1 = vpop.eup %3779 }
 0x2c3   : > { %v1045_v3 = vmul.f32 %v3780_v1, %v1029_v42 }
 0x2c5   : > { %v1053_v5 = vmul.f32 %v3305_v2, %v1045_v3 }
 0x2c6   : > { %v3782_v6 = vpop.eup %3781 }
 0x2c7   : > { %v1046_v7 = vmul.f32 %v3782_v6, %v1030_v46  ;;  %v1061_v8 = vadd.f32 %v3306_v4, %v1053_v5 }
 0x2c9   : > { %v1054_v11 = vmul.f32 %v3305_v2, %v1046_v7  ;;  %3494 = vmatprep.mubr.msk.f32.mxu1 %vm1019_vm7, %v1061_v8 }
 0x2cb   : > { %v1062_v12 = vadd.f32 %v3306_v4, %v1054_v11 }
 0x2cd   : > { %3495 = vmatmul.mubr.msk.f32.vlgmr.msra.gmra.mrb[0].mxu1 %vm1019_vm7, %v1062_v12 }
 0x2ce   : > { %3691 = vmatpush3.bf16.msra.mxu1 %v3688_v58  ;;  %3505 = vmatprep.mubr.msk.f32.mxu1 %vm1019_vm7, %v1061_v8 }
 0x2cf   : > { %3693 = vmatprep.subr.bf16.mxu1 %v3692_v13 }
 0x2d2   : > { %3695 = vmatpush3.bf16.msra.mxu1 %v3692_v13 }
 0x2d3   : > { %3697 = vmatprep.subr.bf16.mxu1 %v3696_v16 }
 0x2d5   : > { %3506 = vmatmul.mubr.msk.f32.vlgmr.msra.gmra.mrb[2].mxu1 %vm1019_vm7, %v1062_v12 }
 0x2d6   : > { %3699 = vmatpush3.bf16.msra.mxu1 %v3696_v16  ;;  %3516 = vmatprep.mubr.msk.f32.mxu1 %vm1019_vm7, %v1061_v8 }
 0x2d7   : > { %3701 = vmatprep.subr.bf16.mxu1 %v3700_v19 }
 0x2da   : > { %3703 = vmatpush3.bf16.msra.mxu1 %v3700_v19 }
 0x2db   : > { %3519 = vmatprep.subr.mxu1 %v3867_v20 }
 0x2dd   : > { %3517 = vmatmul.mubr.msk.f32.vlgmr.msra.gmra.mrb[4].mxu1 %vm1019_vm7, %v1062_v12 }
 0x2de   : > { %3521 = vmatprep.mubr.msk.f32.mxu1 %vm3868_vm8, %v3867_v20 }
 0x3a0   : > { %v3496_v21 = vpop.f32.mrb[0].mxu1 }
 0x3a1   : > { %v1146_v22 = vpop.f32.mrb[1].mxu1  ;;  %v4198_v32 = vadd.f32 %v3496_v21, %v3307_v26 }
 0x3a2   : > { %v4182_v28 = vadd.f32 %v3307_v26, %v1146_v22 }
 0x3a8   : > { %v3507_v24 = vpop.f32.mrb[2].mxu1 }
 0x3a9   : > { %v1232_v25 = vpop.f32.mrb[3].mxu1  ;;  %v4185_v29 = vadd.f32 %v3507_v24, %v3310_v23 }
 0x3aa   : > { %v4178_v27 = vadd.f32 %v3310_v23, %v1232_v25 }
 0x3ac   : > { %3520 = vmatpush3.xpose.msk.msra.mxu1 %vm1327_vm9, %v4178_v27 }
 0x3ad   : > { %3524 = vmatprep.subr.mxu1 %v3867_v20 }
 0x3af   : > { %3522 = vmatmul.mubr.msk.f32.vlgmr.msra.gmra.mrb[6].mxu1 %vm1327_vm9, %v4182_v28 }
 0x3b0   : > { %v3518_v31 = vpop.f32.mrb[4].mxu1  ;;  %3525 = vmatpush3.xpose.msk.msra.mxu1 %vm1327_vm9, %v4185_v29  ;;  %3526 = vmatprep.mubr.msk.f32.mxu1 %vm3868_vm8, %v3867_v20 }
 0x3b1   : > { %v4200_v33 = vadd.f32 %v3518_v31, %v3313_v30  ;;  %v1318_v34 = vpop.f32.mrb[5].mxu1  ;;  %3534 = vmatprep.subr.mxu1 %v3867_v20 }
 0x3b2   : > { %v4203_v35 = vadd.f32 %v3313_v30, %v1318_v34 }
 0x3b3   : > { %3527 = vmatmul.mubr.msk.f32.vlgmr.msra.gmra.mrb[8].mxu1 %vm1327_vm9, %v4198_v32 }
 0x3b4   : > { %3530 = vmatpush3.msra.mxu0 %v4203_v35  ;;  %3535 = vmatpush3.msra.mxu1 %v4200_v33 }
 0x3b5   : > { %3539 = vmatprep.subr.mxu0 %v3867_v20  ;;  %3536 = vmatprep.mubr.msk.f32.mxu1 %vm3868_vm8, %v3867_v20 }
 0x3b6   : > { %3544 = vmatprep.subr.mxu1 %v3867_v20 }
 0x482   : > { %v1400_v38 = vpop.f32.mrb[6].mxu1 }
 0x483   : > { %v1480_v40 = vmul.f32 0.35355338, %v1400_v38  ;;  %v3523_v41 = vpop.f32.mrb[7].mxu1 }
 0x485   : > { %v1482_v42 = vadd.f32 %v1480_v40, %v4213_v39 }
 0x486   : > { %v1476_v43 = vpop.f32.mrb[8].mxu1 }
 0x487   : > { %v1481_v44 = vmul.f32 0.35355338, %v1476_v43  ;;  %v3528_v45 = vpop.f32.mrb[9].mxu1  ;;  %v1484_v46 = vsel %vm1327_vm9, %v1482_v42, -inf }
 0x488   : > { %1485 = vmax.xlane.f32.xlu0 %v1484_v46 }
 0x489   : > { %v1483_v47 = vadd.f32 %v1481_v44, %v4213_v39 }
 0x48b   : > { %v1487_v48 = vsel %vm1327_vm9, %v1483_v47, -inf }
 0x48c   : > { %1488 = vmax.xlane.f32.xlu1 %v1487_v48 }
 0x49d   : > { %1734 = vrot.lane.b32.xlu1 %v4185_v29, %s3869_s29 }
 0x4a1   : > { %1654 = vrot.lane.b32.xlu1 %v4182_v28, %s3869_s29 }
 0x515   : > { %v1486_v49 = vpop.xlane.xlu0 %1485 }
 0x516   : > { %v1490_v50 = vsub.f32 %v1482_v42, %v1486_v49 }
 0x518   : > { %v1492_v51 = vmul.f32 1.442695, %v1490_v50 }
 0x519   : > { %v1489_v52 = vpop.xlane.xlu1 %1488 }
 0x51a   : > { %3783 = vpow2.f32 %v1492_v51  ;;  %v1491_v53 = vsub.f32 %v1483_v47, %v1489_v52 }
 0x51c   : > { %v1494_v54 = vmul.f32 1.442695, %v1491_v53 }
 0x51d   : > { %v1735_v59 = vpop.permute.xlu1 %1734 }
 0x51e   : > { %3785 = vpow2.f32 %v1494_v54 }
 0x521   : > { %v1655_v60 = vpop.permute.xlu1 %1654 }
 0x524   : > { %v3784_v55 = vpop.eup %3783 }
 0x525   : > { %v1496_v56 = vsel %vm1327_vm9, %v3784_v55, 0.0 }
 0x526   : > { %1497 = vadd.xlane.f32.xlu0 %v1496_v56 }
 0x528   : > { %v3786_v57 = vpop.eup %3785 }
 0x529   : > { %v1499_v58 = vsel %vm1327_vm9, %v3786_v57, 0.0 }
 0x52a   : > { %1500 = vadd.xlane.f32.xlu1 %v1499_v58 }
 0x53b   : > { %1732 = vrot.lane.b32.xlu1 %v4198_v32, %s3869_s29 }
 0x53c   : > { %1656 = vrot.lane.b32.xlu0 %v4178_v27, %s3869_s29 }
 0x5b3   : > { %v1498_v61 = vpop.xlane.xlu0 %1497 }
 0x5b4   : > { %3787 = vrcp.f32 %v1498_v61 }
 0x5b7   : > { %v1501_v62 = vpop.xlane.xlu1 %1500  ;;  %v1657_v1 = vpop.permute.xlu0 %1656 }
 0x5b8   : > { %3789 = vrcp.f32 %v1501_v62 }
 0x5bb   : > { %v1733_v4 = vpop.permute.xlu1 %1732 }
 0x5be   : > { %v3788_v63 = vpop.eup %3787 }
 0x5bf   : > { %v1504_v0 = vmul.f32 %v3788_v63, %v3784_v55 }
 0x5c1   : > { %3532 = vmatmul.mubr.msk.f32.vlgmr.msra.gmra.mrb[0].mxu0 %vm1327_vm9, %v1504_v0 }
 0x5c2   : > { %v3790_v2 = vpop.eup %3789  ;;  %3540 = vmatpush3.xpose.msk.msra.mxu0 %vm1327_vm9, %v1657_v1  ;;  %3541 = vmatprep.mubr.msk.f32.mxu0 %vm3868_vm8, %v3867_v20 }
 0x5c3   : > { %v1505_v3 = vmul.f32 %v3790_v2, %v3786_v57  ;;  %3549 = vmatprep.subr.mxu0 %v3867_v20 }
 0x5c5   : > { %3537 = vmatmul.mubr.msk.f32.vlgmr.msra.gmra.mrb[10].mxu1 %vm1327_vm9, %v1505_v3  ;;  %3542 = vmatmul.mubr.msk.f32.vlgmr.msra.gmra.mrb[2].mxu0 %vm1327_vm9, %v1655_v60 }
 0x5c6   : > { %3545 = vmatpush3.xpose.msk.msra.mxu1 %vm1327_vm9, %v1735_v59  ;;  %3546 = vmatprep.mubr.msk.f32.mxu1 %vm3868_vm8, %v3867_v20 }
 0x5c7   : > { %3554 = vmatprep.subr.mxu1 %v3867_v20  ;;  %3551 = vmatprep.mubr.msk.f32.mxu0 %vm3868_vm8, %v3867_v20 }
 0x5c9   : > { %3547 = vmatmul.mubr.msk.f32.vlgmr.msra.gmra.mrb[12].mxu1 %vm1327_vm9, %v1733_v4 }
 0x5ca   : > { %3556 = vmatprep.mubr.msk.f32.mxu1 %vm3868_vm8, %v3867_v20 }
 0x694   : > { %v1575_v5 = vpop.f32.mrb[0].mxu0 }
 0x695   : > { %1652 = vst.msk [vmem:[#allocation3] sm:$0xff] %vm1327_vm9, %v1575_v5  ;;  %v3533_v6 = vpop.f32.mrb[1].mxu0 }
 0x698   : > { %v1648_v7 = vpop.f32.mrb[10].mxu1  ;;  %v1728_v8 = vpop.f32.mrb[2].mxu0 }
 0x699   : > { %1653 = vst.msk [vmem:[#allocation3 + $0x8] sm:$0xff] %vm1327_vm9, %v1648_v7  ;;  %v1810_v9 = vmul.f32 0.35355338, %v1728_v8  ;;  %v3538_v10 = vpop.f32.mrb[11].mxu1  ;;  %v3543_v11 = vpop.f32.mrb[3].mxu0 }
 0x69b   : > { %v1812_v12 = vadd.f32 %v1810_v9, %v4213_v39 }
 0x69c   : > { %v1806_v13 = vpop.f32.mrb[12].mxu1 }
 0x69d   : > { %v1811_v14 = vmul.f32 0.35355338, %v1806_v13  ;;  %v3548_v15 = vpop.f32.mrb[13].mxu1  ;;  %v1814_v16 = vsel %vm1327_vm9, %v1812_v12, -inf }
 0x69e   : > { %1815 = vmax.xlane.f32.xlu0 %v1814_v16 }
 0x69f   : > { %v1813_v17 = vadd.f32 %v1811_v14, %v4213_v39 }
 0x6a1   : > { %v1817_v18 = vsel %vm1327_vm9, %v1813_v17, -inf }
 0x6a2   : > { %1818 = vmax.xlane.f32.xlu1 %v1817_v18 }
 0x6b3   : > { %1914 = vrot.lane.b32.xlu1 %v4200_v33, %s3869_s29 }
 0x6b4   : > { %1837 = vrot.lane.b32.xlu0 %v4203_v35, %s3869_s29  ;;  %s4516_s29 = sld [smem:[#allocation9_spill]] }
 0x6b7   : > { %2003 = vrot.lane.b32.xlu1 %v4178_v27, %s3870_s28 }
 0x6ba   : > { %p3349_p5 = scmp.ne.s32.totalorder %s4516_s29, 1 }
 0x6bb   : > { %2081 = vrot.lane.b32.xlu1 %v4185_v29, %s3870_s28 }
 0x6bf   : > { %2079 = vrot.lane.b32.xlu1 %v4198_v32, %s3870_s28 }
 0x72b   : > { %v1816_v19 = vpop.xlane.xlu0 %1815 }
 0x72c   : > { %v1820_v21 = vsub.f32 %v1812_v12, %v1816_v19 }
 0x72e   : > { %v1822_v22 = vmul.f32 1.442695, %v1820_v21 }
 0x72f   : > { %v1838_v23 = vpop.permute.xlu0 %1837  ;;  %v1819_v24 = vpop.xlane.xlu1 %1818 }
 0x730   : > { %3791 = vpow2.f32 %v1822_v22  ;;  %v1821_v25 = vsub.f32 %v1813_v17, %v1819_v24  ;;  %3550 = vmatpush3.msra.mxu0 %v1838_v23 }
 0x731   : > { %3559 = vmatprep.subr.mxu0 %v3867_v20 }
 0x732   : > { %v1824_v26 = vmul.f32 1.442695, %v1821_v25 }
 0x733   : > { %v1915_v30 = vpop.permute.xlu1 %1914 }
 0x734   : > { %3793 = vpow2.f32 %v1824_v26  ;;  %3555 = vmatpush3.msra.mxu1 %v1915_v30 }
 0x735   : > { %3564 = vmatprep.subr.mxu1 %v3867_v20 }
 0x737   : > { %v2004_v43 = vpop.permute.xlu1 %2003 }
 0x73a   : > { %v3792_v31 = vpop.eup %3791 }
 0x73b   : > { %v1826_v34 = vsel %vm1327_vm9, %v3792_v31, 0.0  ;;  %v2082_v47 = vpop.permute.xlu1 %2081 }
 0x73c   : > { %1827 = vadd.xlane.f32.xlu0 %v1826_v34 }
 0x73e   : > { %v3794_v38 = vpop.eup %3793 }
 0x73f   : > { %v1829_v40 = vsel %vm1327_vm9, %v3794_v38, 0.0  ;;  %v2080_v50 = vpop.permute.xlu1 %2079 }
 0x740   : > { %1830 = vadd.xlane.f32.xlu0 %v1829_v40 }
 0x756   : > { %2001 = vrot.lane.b32.xlu0 %v4182_v28, %s3870_s28 }
 0x7c9   : > { %v1828_v41 = vpop.xlane.xlu0 %1827 }
 0x7ca   : > { %3795 = vrcp.f32 %v1828_v41 }
 0x7cd   : > { %v1831_v42 = vpop.xlane.xlu0 %1830 }
 0x7ce   : > { %3797 = vrcp.f32 %v1831_v42 }
 0x7d1   : > { %v2002_v49 = vpop.permute.xlu0 %2001 }
 0x7d4   : > { %v3796_v44 = vpop.eup %3795 }
 0x7d5   : > { %v1834_v45 = vmul.f32 %v3796_v44, %v3792_v31 }
 0x7d7   : > { %3552 = vmatmul.mubr.msk.f32.vlgmr.msra.gmra.mrb[4].mxu0 %vm1327_vm9, %v1834_v45 }
 0x7d8   : > { %v3798_v46 = vpop.eup %3797  ;;  %3560 = vmatpush3.xpose.msk.msra.mxu0 %vm1327_vm9, %v2004_v43  ;;  %3561 = vmatprep.mubr.msk.f32.mxu0 %vm3868_vm8, %v3867_v20 }
 0x7d9   : > { %v1835_v48 = vmul.f32 %v3798_v46, %v3794_v38  ;;  %3569 = vmatprep.subr.mxu0 %v3867_v20 }
 0x7db   : > { %3557 = vmatmul.mubr.msk.f32.vlgmr.msra.gmra.mrb[14].mxu1 %vm1327_vm9, %v1835_v48  ;;  %3562 = vmatmul.mubr.msk.f32.vlgmr.msra.gmra.mrb[6].mxu0 %vm1327_vm9, %v2002_v49 }
 0x7dc   : > { %3565 = vmatpush3.xpose.msk.msra.mxu1 %vm1327_vm9, %v2082_v47  ;;  %3566 = vmatprep.mubr.msk.f32.mxu1 %vm3868_vm8, %v3867_v20 }
 0x7dd   : > { %3574 = vmatprep.subr.mxu1 %v3867_v20  ;;  %3571 = vmatprep.mubr.msk.f32.mxu0 %vm3868_vm8, %v3867_v20 }
 0x7df   : > { %3567 = vmatmul.mubr.msk.f32.vlgmr.msra.gmra.mrb[16].mxu1 %vm1327_vm9, %v2080_v50 }
 0x7e0   : > { %3576 = vmatprep.mubr.msk.f32.mxu1 %vm3868_vm8, %v3867_v20 }
 0x8aa   : > { %v4283_v51 = vpop.f32.mrb[4].mxu0 }
 0x8ab   : > { %v3553_v52 = vpop.f32.mrb[5].mxu0 }
 0x8ae   : > { %v4285_v53 = vpop.f32.mrb[14].mxu1  ;;  %v2075_v54 = vpop.f32.mrb[6].mxu0 }
 0x8af   : > { %v2157_v55 = vmul.f32 0.35355338, %v2075_v54  ;;  %v3558_v56 = vpop.f32.mrb[15].mxu1  ;;  %v3563_v57 = vpop.f32.mrb[7].mxu0 }
 0x8b1   : > { %v2159_v58 = vadd.f32 %v2157_v55, %v4213_v39 }
 0x8b2   : > { %v2153_v59 = vpop.f32.mrb[16].mxu1 }
 0x8b3   : > { %v2158_v60 = vmul.f32 0.35355338, %v2153_v59  ;;  %v3568_v61 = vpop.f32.mrb[17].mxu1  ;;  %v2161_v62 = vsel %vm1327_vm9, %v2159_v58, -inf }
 0x8b4   : > { %2162 = vmax.xlane.f32.xlu0 %v2161_v62  ;;  %v2693_v61 = vld [vmem:[%s4040_s24] sm:$0xff]  ;;  %v2694_v62 = vld [vmem:[%s4040_s24 + $0x8] sm:$0xff] }
 0x8b5   : > { %v2160_v63 = vadd.f32 %v2158_v60, %v4213_v39 }
 0x8b7   : > { %v2164_v0 = vsel %vm1327_vm9, %v2160_v63, -inf }
 0x8b8   : > { %2165 = vmax.xlane.f32.xlu1 %v2164_v0  ;;  %v2695_v0 = vld [vmem:[%s4040_s24 + $0x10] sm:$0xff] }
 0x8c9   : > { %2259 = vrot.lane.b32.xlu1 %v4200_v33, %s3870_s28 }
 0x8ca   : > { %2183 = vrot.lane.b32.xlu0 %v4203_v35, %s3870_s28  ;;  %s4517_s28 = sld [smem:[#allocation20_spill]] (!%p3349_p5) }
 0x8cd   : > { %2348 = vrot.lane.b32.xlu1 %v4178_v27, %s3871_s30 }
 0x8d1   : > { %2426 = vrot.lane.b32.xlu1 %v4185_v29, %s3871_s30 }
 0x8d5   : > { %2424 = vrot.lane.b32.xlu1 %v4198_v32, %s3871_s30 }
 0x941   : > { %v2163_v1 = vpop.xlane.xlu0 %2162 }
 0x942   : > { %v2167_v2 = vsub.f32 %v2159_v58, %v2163_v1  ;;  %v2696_v1 = vld [vmem:[%s4040_s24 + $0x18] sm:$0xff] }
 0x944   : > { %v2169_v3 = vmul.f32 1.442695, %v2167_v2  ;;  %v3708_v2 = vpack.c.bf16 %v2696_v1, %v2695_v0  ;;  %v2941_v0 = vld [vmem:[%s4067_s7 + $0x40] sm:$0xff]  ;;  %v2942_v1 = vld [vmem:[%s4067_s7 + $0x48] sm:$0xff] }
 0x945   : > { %v2184_v4 = vpop.permute.xlu0 %2183  ;;  %v2166_v5 = vpop.xlane.xlu1 %2165 }
 0x946   : > { %3799 = vpow2.f32 %v2169_v3  ;;  %v2168_v6 = vsub.f32 %v2160_v63, %v2166_v5  ;;  %3570 = vmatpush3.msra.mxu0 %v2184_v4  ;;  %v3704_v63 = vpack.c.bf16 %v2694_v62, %v2693_v61  ;;  %v2939_v61 = vld [vmem:[%s4067_s7 + $0x30] sm:$0xff]  ;;  %v2940_v62 = vld [vmem:[%s4067_s7 + $0x38] sm:$0xff] }
 0x947   : > { %3579 = vmatprep.subr.mxu0 %v3867_v20 }
 0x948   : > { %v2171_v7 = vmul.f32 1.442695, %v2168_v6 }
 0x949   : > { %v2260_v8 = vpop.permute.xlu1 %2259 }
 0x94a   : > { %3801 = vpow2.f32 %v2171_v7  ;;  %3575 = vmatpush3.msra.mxu1 %v2260_v8 }
 0x94b   : > { %3584 = vmatprep.subr.mxu1 %v3867_v20 }
 0x94d   : > { %v2349_v12 = vpop.permute.xlu1 %2348 }
 0x950   : > { %v3800_v27 = vpop.eup %3799 }
 0x951   : > { %v2173_v29 = vsel %vm1327_vm9, %v3800_v27, 0.0  ;;  %v2427_v16 = vpop.permute.xlu1 %2426 }
 0x952   : > { %2174 = vadd.xlane.f32.xlu0 %v2173_v29 }
 0x954   : > { %v3802_v32 = vpop.eup %3801 }
 0x955   : > { %v2176_v9 = vsel %vm1327_vm9, %v3802_v32, 0.0  ;;  %v2425_v18 = vpop.permute.xlu1 %2424 }
 0x956   : > { %2177 = vadd.xlane.f32.xlu0 %v2176_v9 }
 0x96c   : > { %2346 = vrot.lane.b32.xlu0 %v4182_v28, %s3871_s30 }
 0x9df   : > { %v2175_v10 = vpop.xlane.xlu0 %2174 }
 0x9e0   : > { %3803 = vrcp.f32 %v2175_v10 }
 0x9e3   : > { %v2178_v11 = vpop.xlane.xlu0 %2177 }
 0x9e4   : > { %3805 = vrcp.f32 %v2178_v11 }
 0x9e7   : > { %v2347_v28 = vpop.permute.xlu0 %2346 }
 0x9ea   : > { %v3804_v13 = vpop.eup %3803 }
 0x9eb   : > { %v2181_v14 = vmul.f32 %v3804_v13, %v3800_v27 }
 0x9ed   : > { %3572 = vmatmul.mubr.msk.f32.vlgmr.msra.gmra.mrb[8].mxu0 %vm1327_vm9, %v2181_v14 }
 0x9ee   : > { %v3806_v15 = vpop.eup %3805  ;;  %3580 = vmatpush3.xpose.msk.msra.mxu0 %vm1327_vm9, %v2349_v12  ;;  %3581 = vmatprep.mubr.msk.f32.mxu0 %vm3868_vm8, %v3867_v20 }
 0x9ef   : > { %v2182_v17 = vmul.f32 %v3806_v15, %v3802_v32  ;;  %3589 = vmatprep.subr.mxu0 %v3867_v20  ;;  %v3340_v32 = vld [vmem:[%s4514_s22] ss:$0 sm:$0xff] }
 0x9f1   : > { %3577 = vmatmul.mubr.msk.f32.vlgmr.msra.gmra.mrb[18].mxu1 %vm1327_vm9, %v2182_v17  ;;  %3582 = vmatmul.mubr.msk.f32.vlgmr.msra.gmra.mrb[10].mxu0 %vm1327_vm9, %v2347_v28 }
 0x9f2   : > { %3585 = vmatpush3.xpose.msk.msra.mxu1 %vm1327_vm9, %v2427_v16  ;;  %3586 = vmatprep.mubr.msk.f32.mxu1 %vm3868_vm8, %v3867_v20 }
 0x9f3   : > { %3594 = vmatprep.subr.mxu1 %v3867_v20  ;;  %3591 = vmatprep.mubr.msk.f32.mxu0 %vm3868_vm8, %v3867_v20 }
 0x9f5   : > { %3587 = vmatmul.mubr.msk.f32.vlgmr.msra.gmra.mrb[20].mxu1 %vm1327_vm9, %v2425_v18 }
 0x9f6   : > { %3596 = vmatprep.mubr.msk.f32.mxu1 %vm3868_vm8, %v3867_v20 }
 0xac0   : > { %v2255_v19 = vpop.f32.mrb[8].mxu0 }
 0xac1   : > { %v3573_v21 = vpop.f32.mrb[9].mxu0 }
 0xac4   : > { %v2331_v22 = vpop.f32.mrb[18].mxu1  ;;  %v2420_v23 = vpop.f32.mrb[10].mxu0 }
 0xac5   : > { %v2502_v24 = vmul.f32 0.35355338, %v2420_v23  ;;  %v3578_v25 = vpop.f32.mrb[19].mxu1  ;;  %v3583_v26 = vpop.f32.mrb[11].mxu0 }
 0xac6   : > { %v2831_v25 = vld [vmem:[%s4057_s1] sm:$0xff]  ;;  %v2832_v26 = vld [vmem:[%s4057_s1 + $0x8] sm:$0xff] }
 0xac7   : > { %v2504_v30 = vadd.f32 %v2502_v24, %v4213_v39 }
 0xac8   : > { %v2498_v31 = vpop.f32.mrb[20].mxu1 }
 0xac9   : > { %v2503_v34 = vmul.f32 0.35355338, %v2498_v31  ;;  %v3588_v38 = vpop.f32.mrb[21].mxu1  ;;  %v2506_v40 = vsel %vm1327_vm9, %v2504_v30, -inf  ;;  %v2833_v31 = vld [vmem:[%s4057_s1 + $0x10] sm:$0xff] }
 0xaca   : > { %2507 = vmax.xlane.f32.xlu0 %v2506_v40  ;;  %v2933_v40 = vld [vmem:[%s4067_s7] sm:$0xff] }
 0xacb   : > { %v2505_v41 = vadd.f32 %v2503_v34, %v4213_v39  ;;  %v2834_v34 = vld [vmem:[%s4057_s1 + $0x18] sm:$0xff] }
 0xacc   : > { %v3716_v38 = vpack.c.bf16 %v2834_v34, %v2833_v31 }
 0xacd   : > { %v2509_v42 = vsel %vm1327_vm9, %v2505_v41, -inf }
 0xace   : > { %2510 = vmax.xlane.f32.xlu1 %v2509_v42  ;;  %v2935_v42 = vld [vmem:[%s4067_s7 + $0x10] sm:$0xff] }
 0xadf   : > { %2604 = vrot.lane.b32.xlu1 %v4200_v33, %s3871_s30 }
 0xae3   : > { %1992 = vrot.lane.b32.xlu1 %v4283_v51, %s3872_s25 }
 0xae7   : > { %1994 = vrot.lane.b32.xlu1 %v4285_v53, %s3872_s25 }
 0xaeb   : > { %2339 = vrot.lane.b32.xlu1 %v2331_v22, %s3873_s5 }
 0xb57   : > { %v2508_v20 = vpop.xlane.xlu0 %2507 }
 0xb58   : > { %v2512_v43 = vsub.f32 %v2504_v30, %v2508_v20  ;;  %v3712_v30 = vpack.c.bf16 %v2832_v26, %v2831_v25 }
 0xb5a   : > { %v2514_v44 = vmul.f32 1.442695, %v2512_v43  ;;  %v2936_v43 = vld [vmem:[%s4067_s7 + $0x18] sm:$0xff] }
 0xb5b   : > { %v2511_v45 = vpop.xlane.xlu1 %2510 }
 0xb5c   : > { %3807 = vpow2.f32 %v2514_v44  ;;  %v2513_v39 = vsub.f32 %v2505_v41, %v2511_v45  ;;  %v2934_v41 = vld [vmem:[%s4067_s7 + $0x8] sm:$0xff]  ;;  %v3724_v44 = vpack.c.bf16 %v2936_v43, %v2935_v42  ;;  %v2937_v45 = vld [vmem:[%s4067_s7 + $0x20] sm:$0xff] }
 0xb5d   : > { %v3720_v20 = vpack.c.bf16 %v2934_v41, %v2933_v40 }
 0xb5e   : > { %v2516_v46 = vmul.f32 1.442695, %v2513_v39  ;;  %v2938_v39 = vld [vmem:[%s4067_s7 + $0x28] sm:$0xff] }
 0xb5f   : > { %v2605_v47 = vpop.permute.xlu1 %2604 }
 0xb60   : > { %3809 = vpow2.f32 %v2516_v46  ;;  %3595 = vmatpush3.msra.mxu1 %v2605_v47  ;;  %v3728_v46 = vpack.c.bf16 %v2938_v39, %v2937_v45 }
 0xb61   : > { %3713 = vmatprep.subr.bf16.mxu1 %v3712_v30 }
 0xb63   : > { %v1993_v33 = vpop.permute.xlu1 %1992 }
 0xb64   : > { %1999 = vst.msk [vmem:[#allocation3] sm:$0xff] %vm1998_vm10, %v1993_v33 }
 0xb66   : > { %v3808_v48 = vpop.eup %3807 }
 0xb67   : > { %v1995_v49 = vpop.permute.xlu1 %1994  ;;  %v2518_v50 = vsel %vm1327_vm9, %v3808_v48, 0.0 }
 0xb68   : > { %2000 = vst.msk [vmem:[#allocation3 + $0x8] sm:$0xff] %vm1998_vm10, %v1995_v49  ;;  %2519 = vadd.xlane.f32.xlu0 %v2518_v50 }
 0xb6a   : > { %v3810_v51 = vpop.eup %3809 }
 0xb6b   : > { %v2340_v52 = vpop.permute.xlu1 %2339  ;;  %v2521_v53 = vsel %vm1327_vm9, %v3810_v51, 0.0 }
 0xb6c   : > { %2345 = vst.msk [vmem:[#allocation3 + $0x8] sm:$0xff] %vm2343_vm11, %v2340_v52  ;;  %2522 = vadd.xlane.f32.xlu0 %v2521_v53  ;;  %v3343_v53 = vld [vmem:[%s863_s0] ss:$0 sm:$0xff] }
 0xb82   : > { %2528 = vrot.lane.b32.xlu0 %v4203_v35, %s3871_s30 }
 0xb86   : > { %2337 = vrot.lane.b32.xlu0 %v2255_v19, %s3873_s5 }
 0xbf5   : > { %v2520_v54 = vpop.xlane.xlu0 %2519 }
 0xbf6   : > { %3811 = vrcp.f32 %v2520_v54 }
 0xbf9   : > { %v2523_v55 = vpop.xlane.xlu0 %2522 }
 0xbfa   : > { %3813 = vrcp.f32 %v2523_v55  ;;  %v3344_v55 = vld [vmem:[%s4515_s19] ss:$0 sm:$0xff] }
 0xbfd   : > { %v2529_v56 = vpop.permute.xlu0 %2528 }
 0xbfe   : > { %3590 = vmatpush3.msra.mxu0 %v2529_v56 }
 0xbff   : > { %3705 = vmatprep.subr.bf16.mxu0 %v3704_v63 }
 0xc00   : > { %v3812_v57 = vpop.eup %3811 }
 0xc01   : > { %v2526_v58 = vmul.f32 %v3812_v57, %v3808_v48  ;;  %v2338_v59 = vpop.permute.xlu0 %2337 }
 0xc02   : > { %2344 = vst.msk [vmem:[#allocation3] sm:$0xff] %vm2343_vm11, %v2338_v59 }
 0xc03   : > { %3592 = vmatmul.mubr.msk.f32.vlgmr.msra.gmra.mrb[12].mxu0 %vm1327_vm9, %v2526_v58 }
 0xc04   : > { %v3814_v60 = vpop.eup %3813  ;;  %3707 = vmatpush3.bf16.msra.mxu0 %v3704_v63  ;;  %v3732_v63 = vpack.c.bf16 %v2940_v62, %v2939_v61 }
 0xc05   : > { %v2527_v35 = vmul.f32 %v3814_v60, %v3810_v51  ;;  %3709 = vmatprep.subr.bf16.mxu0 %v3708_v2 }
 0xc07   : > { %3597 = vmatmul.mubr.msk.f32.vlgmr.msra.gmra.mrb[22].mxu1 %vm1327_vm9, %v2527_v35 }
 0xc08   : > { %3711 = vmatpush3.bf16.msra.mxu0 %v3708_v2  ;;  %3715 = vmatpush3.bf16.msra.mxu1 %v3712_v30  ;;  %v3736_v2 = vpack.c.bf16 %v2942_v1, %v2941_v0 }
 0xc09   : > { %3717 = vmatprep.subr.bf16.mxu1 %v3716_v38  ;;  %3721 = vmatprep.subr.bf16.mxu0 %v3720_v20 }
 0xc0c   : > { %3719 = vmatpush3.bf16.msra.mxu1 %v3716_v38 }
 0xcd6   : > { %v2600_v3 = vpop.f32.mrb[12].mxu0 }
 0xcd7   : > { %2682 = vrot.lane.b32.xlu0 %v2600_v3, %s3874_s9  ;;  %v3593_v4 = vpop.f32.mrb[13].mxu0  ;;  %v2943_v3 = vld [vmem:[%s4067_s7 + $0x50] sm:$0xff] }
 0xcd8   : > { %v2944_v4 = vld [vmem:[%s4067_s7 + $0x58] sm:$0xff] }
 0xcda   : > { %v2676_v5 = vpop.f32.mrb[22].mxu1 }
 0xcdb   : > { %2684 = vrot.lane.b32.xlu1 %v2676_v5, %s3874_s9  ;;  %v3598_v6 = vpop.f32.mrb[23].mxu1  ;;  %v3740_v5 = vpack.c.bf16 %v2944_v4, %v2943_v3  ;;  %s4518_s9 = sld [smem:[#allocation21_spill]] (!%p3349_p5) }
 0xcdc   : > { %v2945_v6 = vld [vmem:[%s4067_s7 + $0x60] sm:$0xff] }
 0xd49   : > { %v2683_v7 = vpop.permute.xlu0 %2682 }
 0xd4a   : > { %2689 = vst.msk [vmem:[#allocation3] sm:$0xff] %vm2688_vm12, %v2683_v7  ;;  %v2946_v7 = vld [vmem:[%s4067_s7 + $0x68] sm:$0xff] }
 0xd4d   : > { %v2685_v8 = vpop.permute.xlu1 %2684 }
 0xd4e   : > { %2690 = vst.msk [vmem:[#allocation3 + $0x8] sm:$0xff] %vm2688_vm12, %v2685_v8  ;;  %v3744_v8 = vpack.c.bf16 %v2946_v7, %v2945_v6 }
 0xd51   : > { %v2691_v27 = vld [vmem:[#allocation3] sm:$0xff] }
 0xd52   : > { %3607 = vmatprep.mubr.msk.f32.mxu0 %vm1019_vm7, %v2691_v27  ;;  %v2947_v27 = vld [vmem:[%s4067_s7 + $0x70] sm:$0xff] }
 0xd55   : > { %v2692_v29 = vld [vmem:[#allocation3 + $0x8] sm:$0xff] }
 0xd56   : > { %3608 = vmatmul.mubr.msk.f32.vlgmr.msra.gmra.mrb[14].mxu0 %vm1019_vm7, %v2692_v29  ;;  %v2948_v29 = vld [vmem:[%s4067_s7 + $0x78] sm:$0xff] }
 0xd57   : > { %3723 = vmatpush3.bf16.msra.mxu0 %v3720_v20 }
 0xd58   : > { %3725 = vmatprep.subr.bf16.mxu0 %v3724_v44 }
 0xd5b   : > { %3727 = vmatpush3.bf16.msra.mxu0 %v3724_v44 }
 0xd5c   : > { %3729 = vmatprep.subr.bf16.mxu0 %v3728_v46 }
 0xd5f   : > { %3731 = vmatpush3.bf16.msra.mxu0 %v3728_v46 }
 0xd60   : > { %3733 = vmatprep.subr.bf16.mxu0 %v3732_v63 }
 0xd63   : > { %3735 = vmatpush3.bf16.msra.mxu0 %v3732_v63 }
 0xd64   : > { %3737 = vmatprep.subr.bf16.mxu0 %v3736_v2 }
 0xd67   : > { %3739 = vmatpush3.bf16.msra.mxu0 %v3736_v2 }
 0xd68   : > { %3741 = vmatprep.subr.bf16.mxu0 %v3740_v5 }
 0xd6b   : > { %3743 = vmatpush3.bf16.msra.mxu0 %v3740_v5 }
 0xd6c   : > { %3745 = vmatprep.subr.bf16.mxu0 %v3744_v8 }
 0xd6f   : > { %3747 = vmatpush3.bf16.msra.mxu0 %v3744_v8 }
 0xe29   : > { %v3609_v9 = vpop.f32.mrb[14].mxu0 }
 0xe2a   : > { %v2782_v10 = vadd.f32 %v3609_v9, %v3340_v32  ;;  %v2776_v11 = vpop.f32.mrb[15].mxu0  ;;  %v3345_v9 = vld [vmem:[%s874_s27] ss:$0 sm:$0xff] }
 0xe2b   : > { %v2777_v12 = vadd.f32 %v3340_v32, %v2776_v11  ;;  %v3748_v32 = vpack.c.bf16 %v2948_v29, %v2947_v27 }
 0xe2c   : > { %v4353_v13 = vadd.f32 %v2782_v10, %v4124_v37 }
 0xe2d   : > { %v4356_v14 = vadd.f32 %v2777_v12, %v4122_v36  ;;  %3749 = vmatprep.subr.bf16.mxu0 %v3748_v32 }
 0xe2e   : > { %v2792_v15 = vsel %vm1019_vm7, %v4353_v13, 0.0  ;;  %3751 = vmatpush3.bf16.msra.mxu0 %v3748_v32 }
 0xe2f   : > { %2793 = vadd.xlane.f32.xlu1 %v2792_v15  ;;  %v2789_v16 = vsel %vm1019_vm7, %v4356_v14, 0.0 }
 0xe30   : > { %2790 = vadd.xlane.f32.xlu0 %v2789_v16 }
 0xebc   : > { %v2794_v17 = vpop.xlane.xlu1 %2793 }
 0xebd   : > { %v2796_v28 = vmul.f32 0.03125, %v2794_v17  ;;  %v2791_v18 = vpop.xlane.xlu0 %2790 }
 0xebe   : > { %v2795_v37 = vmul.f32 0.03125, %v2791_v18 }
 0xebf   : > { %v2798_v19 = vsub.f32 %v4353_v13, %v2796_v28 }
 0xec0   : > { %v2797_v36 = vsub.f32 %v4356_v14, %v2795_v37 }
 0xec1   : > { %v2800_v23 = vmul.f32 %v2798_v19, %v2798_v19 }
 0xec2   : > { %v2799_v21 = vmul.f32 %v2797_v36, %v2797_v36 }
 0xec3   : > { %v2804_v24 = vsel %vm1019_vm7, %v2800_v23, 0.0 }
 0xec4   : > { %v2801_v22 = vsel %vm1019_vm7, %v2799_v21, 0.0 }
 0xec5   : > { %2802 = vadd.xlane.f32.xlu0 %v2801_v22 }
 0xec9   : > { %2805 = vadd.xlane.f32.xlu0 %v2804_v24  ;;  %v3348_v24 = vld [vmem:[%s882_s4] ss:$0 sm:$0xff] }
 0xf52   : > { %v2803_v47 = vpop.xlane.xlu0 %2802 }
 0xf53   : > { %v2807_v33 = vmul.f32 0.03125, %v2803_v47 }
 0xf55   : > { %v2809_v48 = vadd.f32 1e-05, %v2807_v33 }
 0xf56   : > { %v2806_v49 = vpop.xlane.xlu0 %2805 }
 0xf57   : > { %3815 = vrsqrt.f32 %v2809_v48  ;;  %v2808_v50 = vmul.f32 0.03125, %v2806_v49 }
 0xf59   : > { %v2810_v51 = vadd.f32 1e-05, %v2808_v50 }
 0xf5b   : > { %3817 = vrsqrt.f32 %v2810_v51 }
 0xf61   : > { %v3816_v52 = vpop.eup %3815 }
 0xf62   : > { %v2813_v54 = vmul.f32 %v3816_v52, %v2797_v36 }
 0xf64   : > { %v2821_v56 = vmul.f32 %v3343_v53, %v2813_v54  ;;  %v3350_v54 = vld [vmem:[%s4517_s28] ss:$0 sm:$0xff] (!%p3349_p5) }
 0xf65   : > { %v3818_v57 = vpop.eup %3817 }
 0xf66   : > { %v2814_v58 = vmul.f32 %v3818_v57, %v2798_v19  ;;  %v2829_v59 = vadd.f32 %v3344_v55, %v2821_v56  ;;  %v3351_v56 = vld [vmem:[%s4518_s9] ss:$0 sm:$0xff] (!%p3349_p5) }
 0xf68   : > { %v2822_v60 = vmul.f32 %v3343_v53, %v2814_v58  ;;  %3618 = vmatprep.mubr.msk.f32.mxu1 %vm1019_vm7, %v2829_v59 }
 0xf6a   : > { %v2830_v35 = vadd.f32 %v3344_v55, %v2822_v60 }
 0xf6c   : > { %3619 = vmatmul.mubr.msk.f32.vlgmr.msra.gmra.mrb[24].mxu1 %vm1019_vm7, %v2830_v35 }
0x103f   : > { %v3620_v10 = vpop.f32.mrb[24].mxu1 }
0x1040   : > { %v2920_v11 = vadd.f32 %v3620_v10, %v3345_v9  ;;  %v2914_v12 = vpop.f32.mrb[25].mxu1 }
0x1041   : > { %v2915_v15 = vadd.f32 %v3345_v9, %v2914_v12 }
0x1042   : > { %v2926_v16 = vmul.f32 0.70710677, %v2920_v11  ;;  %v2924_v21 = vmul.f32 0.5, %v2920_v11 }
0x1043   : > { %v2925_v17 = vmul.f32 0.70710677, %v2915_v15  ;;  %v2923_v19 = vmul.f32 0.5, %v2915_v15 }
0x1044   : > { %3819 = verf.f32 %v2926_v16 }
0x1045   : > { %3821 = verf.f32 %v2925_v17 }
0x104e   : > { %v3820_v28 = vpop.eup %3819 }
0x104f   : > { %v3822_v18 = vpop.eup %3821  ;;  %v2930_v37 = vadd.f32 1.0, %v3820_v28 }
0x1050   : > { %v2929_v36 = vadd.f32 1.0, %v3822_v18 }
0x1051   : > { %v2932_v23 = vmul.f32 %v2930_v37, %v2924_v21 }
0x1052   : > { %v2931_v22 = vmul.f32 %v2929_v36, %v2923_v19 }
0x1054   : > { %3653 = vmatprep.mubr.f32.mxu0 %v2931_v22 }
0x1055   : > { %3654 = vmatmul.mubr.f32.vlgmr.msra.gmra.mrb[16].mxu0 %v2932_v23 }
0x1128   : > { %v3655_v25 = vpop.f32.mrb[16].mxu0  ;;  %3038 = sbr.rel (%p3349_p5) target bundleno = 4716 (0x126c), region = 112 }
0x1129   : > { %v3028_v26 = vadd.f32 %v3655_v25, %v3348_v24  ;;  %v3022_v30 = vpop.f32.mrb[17].mxu0 }
0x112a   : > { %v3023_v31 = vadd.f32 %v3348_v24, %v3022_v30 }
0x112b   : > { %v3032_v34 = vadd.f32 %v3028_v26, %v4353_v13 }
0x112c   : > { %v3031_v38 = vadd.f32 %v3023_v31, %v4356_v14 }
0x112d   : > { %3034 = vst.msk [vmem:[#allocation2 + $0x8] sm:$0xff] %vm1019_vm7, %v3032_v34  ;;  %v3044_v41 = vsel (!%p3349_p5), %vm1019_vm7, %v3032_v34, 0.0 }
0x112e   : > { %3033 = vst.msk [vmem:[#allocation2] sm:$0xff] %vm1019_vm7, %v3031_v38  ;;  %v3041_v40 = vsel (!%p3349_p5), %vm1019_vm7, %v3031_v38, 0.0 }
0x112f   : > { %3042 = vadd.xlane.f32.xlu0 %v3041_v40 }
0x1133   : > { %3045 = vadd.xlane.f32.xlu0 %v3044_v41 }
0x11bc   : > { %v3043_v42 = vpop.xlane.xlu0 %3042 }
0x11bd   : > { %v3047_v20 = vmul.f32 0.03125, %v3043_v42 }
0x11bf   : > { %v3049_v43 = vsub.f32 %v3031_v38, %v3047_v20 }
0x11c0   : > { %v3046_v44 = vpop.xlane.xlu0 %3045 }
0x11c1   : > { %v3048_v13 = vmul.f32 0.03125, %v3046_v44  ;;  %v3051_v45 = vmul.f32 %v3049_v43, %v3049_v43 }
0x11c3   : > { %v3050_v14 = vsub.f32 %v3032_v34, %v3048_v13  ;;  %v3053_v39 = vsel %vm1019_vm7, %v3051_v45, 0.0 }
0x11c4   : > { %3054 = vadd.xlane.f32.xlu1 %v3053_v39 }
0x11c5   : > { %v3052_v46 = vmul.f32 %v3050_v14, %v3050_v14 }
0x11c7   : > { %v3056_v47 = vsel %vm1019_vm7, %v3052_v46, 0.0 }
0x11c8   : > { %3057 = vadd.xlane.f32.xlu1 %v3056_v47 }
0x1251   : > { %v3055_v33 = vpop.xlane.xlu1 %3054 }
0x1252   : > { %v3059_v48 = vmul.f32 0.03125, %v3055_v33 }
0x1254   : > { %v3061_v49 = vadd.f32 1e-05, %v3059_v48 }
0x1255   : > { %v3058_v50 = vpop.xlane.xlu1 %3057 }
0x1256   : > { %3823 = vrsqrt.f32 %v3061_v49  ;;  %v3060_v51 = vmul.f32 0.03125, %v3058_v50 }
0x1258   : > { %v3062_v52 = vadd.f32 1e-05, %v3060_v51 }
0x125a   : > { %3825 = vrsqrt.f32 %v3062_v52 }
0x1260   : > { %v3824_v53 = vpop.eup %3823 }
0x1261   : > { %v3065_v55 = vmul.f32 %v3824_v53, %v3049_v43 }
0x1263   : > { %v3073_v57 = vmul.f32 %v3350_v54, %v3065_v55 }
0x1264   : > { %v3826_v58 = vpop.eup %3825 }
0x1265   : > { %v3081_v59 = vadd.f32 %v3351_v56, %v3073_v57  ;;  %v3066_v60 = vmul.f32 %v3826_v58, %v3050_v14 }
0x1267   : > { %3083 = vst.msk [vmem:[#allocation5] sm:$0xff] %vm1019_vm7, %v3081_v59  ;;  %v3074_v35 = vmul.f32 %v3350_v54, %v3066_v60 }
0x1269   : > { %v3082_v61 = vadd.f32 %v3351_v56, %v3074_v35 }
0x126b   : > { %3084 = vst.msk [vmem:[#allocation5 + $0x8] sm:$0xff] %vm1019_vm7, %v3082_v61 }
0x126c PF: > { %s4519_s24 = sld [smem:[#allocation9_spill]]  ;;  %s3875_s6 = smov [#allocation5]  }
0x126d   : > { %s3091_s22 = sshll.u32 %s3875_s6, 4  ;;  %s3092_s22 = int_to_ptr.vmem [resolvable:$true] %s3091_s22 }
0x126e   : > { %s3827_s1 = scalar_lea.vmem %s3092_s22, 256  ;;  %p3834_p10 = scmp.lt.s32.totalorder %s3092_s22, %s3092_s22 }
0x126f   : > { %p3828_p7 = scmp.ne.s32.totalorder %s3092_s22, %s3827_s1  ;;  %p3835_p11 = scmp.lt.s32.totalorder %s3827_s1, %s3827_s1 }
0x1271   : > { %p3836_p12 = por %p3835_p11, %p3834_p10 }
0x1272   : > { %p3756_p6 = scmp.eq.s32.totalorder %s4519_s24, 1 }
0x1274   : > { %p3829_p8 = pnand %p3828_p7, %p3756_p6 }
0x1276   : > { %p3830_p9 = pneg %p3829_p8 }
0x1278   : > { %p3837_p13 = pnand %p3836_p12, %p3830_p9 }
0x127a   : > { %3840 = shalt.err (!%p3837_p13)
}
0x127b   : > { %s4520_s11 = sld [smem:[#allocation22_spill]] }
0x1281   : > { %s3841_s19 = scalar_lea.hbm %s4520_s11, 256 }
0x1282   : > { %p3842_p0 = scmp.ne.s32.totalorder %s4520_s11, %s3841_s19  ;;  %p3847_p3 = scmp.lt.u32.totalorder %s3841_s19, %s4520_s11 }
0x1284   : > { %p3843_p1 = pnand %p3842_p0, %p3756_p6 }
0x1286   : > { %p3844_p2 = pneg %p3843_p1 }
0x1288   : > { %p3849_p4 = pnand %p3847_p3, %p3844_p2 }
0x128a   : > { %3852 = shalt.err (!%p3849_p4)
}
0x128b   : > { %s3876_s29 = smov 128  }
0x128c   : > { %3753 = dma.vmem_to_hbm [thread:$0]  (%p3756_p6), %s3092_s22, 256, %s4520_s11, [#allocation6], %s3876_s29, %s3876_s29, %s3872_s25  }
0x128d   : > { %3858 = dma.done.wait (%p3756_p6), [#allocation6], 256  }
0x128e   : > { %3860 = vsyncadd (%p3756_p6), [#allocation6], 4294967040 }
0x128f PF: > { %s4521_s28 = sld [smem:[#allocation8_spill]] }
0x1295   : > { %s32_s2 = sadd.s32 1, %s4521_s28  }
0x1296   : > { %p29_p5 = scmp.ge.s32.totalorder %s32_s2, 4  }
0x1298   :  { %31 = sbr.rel (!%p29_p5) target bundleno = 15 (0xf), region = 184 }
0x129f   :  { %3107 = vsyncpa [#allocation6], 1 }
0x12a0   :  { %3109 = vsyncpa [#allocation6 + $0x1], 1 }

</bundles_post_ra>
